<compile_context>
chip_gen: v5e
topology: v5e:2x2
jax: 0.10.0
libtpu: 0.0.40
codegen_flags: <defaults>
</compile_context>

<pallas_src>
import numpy as np
import jax
import jax.numpy as jnp
from jax.experimental import pallas as pl
from jax.experimental.pallas import tpu as pltpu

BN_EPS = 1e-5
IN_LANES = 128    # lane-padded flattened input width (9*4 = 36 useful lanes)
OUT_LANES = 128   # lane-padded packed output width (27 state + R reward lanes)


# ----------------------------- Pallas kernel ------------------------------ #
def _dynamics_kernel(x_ref, w_ref, t_ref, out_ref):
    # x_ref  : (TB, 128)    bf16  flattened board planes (lanes >= 36 zero)
    # w_ref  : (L, Dp, Dp)  bf16  folded conv * BN-scale weights per layer
    # t_ref  : (L, 1, Dp)   f32   folded BN shift per layer
    # out_ref: (TB, 128)    f32   [state (27 lanes) | reward (R lanes) | 0 pad]
    n_layers = w_ref.shape[0]
    n_res = (n_layers - 2) // 2

    def affine(idx, act_f32):
        y = jnp.dot(act_f32.astype(jnp.bfloat16), w_ref[idx],
                    preferred_element_type=jnp.float32)
        return y + t_ref[idx]

    # start block: narrow (TB,128) @ (128,Dp) matmul + shift + ReLU
    h = jnp.dot(x_ref[...], w_ref[0, :IN_LANES, :],
                preferred_element_type=jnp.float32)
    h = jnp.maximum(h + t_ref[0], 0.0)

    # residual tower
    for i in range(n_res):
        o = jnp.maximum(affine(1 + 2 * i, h), 0.0)
        o = affine(2 + 2 * i, o)
        h = jnp.maximum(o + h, 0.0)

    # end block + reward head (fully folded); only 128 output lanes needed
    yf = jnp.dot(h.astype(jnp.bfloat16), w_ref[n_layers - 1, :, :OUT_LANES],
                 preferred_element_type=jnp.float32)
    out_ref[...] = (yf + t_ref[n_layers - 1, :, :OUT_LANES]).astype(out_ref.dtype)


# ------------------------------ parameter glue ----------------------------- #
def _fold_bn(gamma, beta, mean, var, conv_bias=None):
    gamma = np.asarray(gamma, np.float32)
    beta = np.asarray(beta, np.float32)
    mean = np.asarray(mean, np.float32)
    var = np.asarray(var, np.float32)
    scale = gamma / np.sqrt(var + BN_EPS)
    bias = np.asarray(conv_bias, np.float32) if conv_bias is not None else np.zeros_like(gamma)
    shift = (bias - mean) * scale + beta
    return scale, shift


def _conv_to_dense(w_oihw):
    """(Cout, Cin, 3, 3) conv (padding=1, 3x3 image) -> (9*Cin, 9*Cout) matrix.

    Row index = p_in*Cin + ci, col index = p_out*Cout + co, with p = y*3 + x.
    """
    w = np.asarray(w_oihw, np.float32)
    cout, cin = w.shape[0], w.shape[1]
    big = np.zeros((9 * cin, 9 * cout), np.float32)
    for y_out in range(3):
        for x_out in range(3):
            po = y_out * 3 + x_out
            for y_in in range(3):
                for x_in in range(3):
                    ky, kx = y_in - y_out + 1, x_in - x_out + 1
                    if 0 <= ky < 3 and 0 <= kx < 3:
                        pi = y_in * 3 + x_in
                        big[pi * cin:(pi + 1) * cin,
                            po * cout:(po + 1) * cout] = w[:, :, ky, kx].T
    return big


def init_params(key, num_res=2, hidden=32, reward_support=1):
    keys = iter(jax.random.split(key, 64))

    def nrm(shape, scale):
        return scale * jax.random.normal(next(keys), shape, jnp.float32)

    def bn_params(c):
        return dict(gamma=1.0 + 0.1 * nrm((c,), 1.0),
                    beta=0.1 * nrm((c,), 1.0),
                    mean=0.1 * nrm((c,), 1.0),
                    var=0.5 + jax.random.uniform(next(keys), (c,), jnp.float32))

    p = {}
    p['w0'] = nrm((hidden, 4, 3, 3), 0.1)
    p['b0'] = nrm((hidden,), 0.1)
    p['bn0'] = bn_params(hidden)
    p['res'] = []
    for _ in range(num_res):
        p['res'].append(dict(w1=nrm((hidden, hidden, 3, 3), 0.05), bn1=bn_params(hidden),
                             w2=nrm((hidden, hidden, 3, 3), 0.05), bn2=bn_params(hidden)))
    p['we'] = nrm((3, hidden, 3, 3), 0.1)
    p['be'] = nrm((3,), 0.1)
    p['bne'] = bn_params(3)
    p['wrc'] = nrm((1, 3, 1, 1), 0.1)
    p['brc'] = nrm((1,), 0.1)
    p['wl'] = nrm((reward_support, 9), 0.1)
    p['bl'] = nrm((reward_support,), 0.1)
    return p


def prepare_kernel_args(params):
    """Pack all layers into two slabs:
       W (L, Dp, Dp) bf16 with the BN scale folded into the columns,
       T (L, 1, Dp) f32 additive shift."""
    hidden = params['w0'].shape[0]
    cin = params['w0'].shape[1]
    n_res = len(params['res'])
    r_dim = params['wl'].shape[0]
    d_hid = 9 * hidden                                  # 288 for hidden=32
    d_out = 27 + r_dim
    dp = max(128, -(-max(d_hid, 9 * cin, d_out) // 128) * 128)   # 384

    n_layers = 2 + 2 * n_res
    W = np.zeros((n_layers, dp, dp), np.float32)
    T = np.zeros((n_layers, 1, dp), np.float32)

    def put(layer, big, scale_c, shift_c):
        k, n = big.shape
        W[layer, :k, :n] = big * np.tile(scale_c, 9)[None, :]   # fold BN scale
        T[layer, 0, :n] = np.tile(shift_c, 9)

    # layer 0: start block (conv bias folded into BN shift)
    s0, t0 = _fold_bn(**params['bn0'], conv_bias=params['b0'])
    put(0, _conv_to_dense(params['w0']), s0, t0)

    # residual tower
    for i, blk in enumerate(params['res']):
        s1, t1 = _fold_bn(**blk['bn1'])
        s2, t2 = _fold_bn(**blk['bn2'])
        put(1 + 2 * i, _conv_to_dense(blk['w1']), s1, t1)
        put(2 + 2 * i, _conv_to_dense(blk['w2']), s2, t2)

    # final layer: end block conv3x3(H->3)+BN, fused with the reward head
    big_e = _conv_to_dense(params['we'])                 # (9H, 27)
    se, te = _fold_bn(**params['bne'], conv_bias=params['be'])
    se_t, te_t = np.tile(se, 9), np.tile(te, 9)          # (27,)
    wrc = np.asarray(params['wrc'], np.float32).reshape(3)
    brc = float(np.asarray(params['brc'])[0])
    wl = np.asarray(params['wl'], np.float32)            # (R, 9)
    bl = np.asarray(params['bl'], np.float32)            # (R,)
    # wr_full[p*3+c, r] = wrc[c] * wl[r, p]
    wr_full = (wl.T[:, None, :] * wrc[None, :, None]).reshape(27, r_dim)
    w_rew = (big_e * se_t[None, :]) @ wr_full            # (9H, R)
    r_bias = te_t @ wr_full + brc * wl.sum(axis=1) + bl  # (R,)

    lf = n_layers - 1
    W[lf, :big_e.shape[0], :27] = big_e * se_t[None, :]
    W[lf, :big_e.shape[0], 27:27 + r_dim] = w_rew
    T[lf, 0, :27] = te_t
    T[lf, 0, 27:27 + r_dim] = r_bias

    return dict(w=jnp.asarray(W, jnp.bfloat16), t=jnp.asarray(T, jnp.float32))


# ------------------------------- forward call ------------------------------ #
def _choose_batch_tiling(b):
    """Rows per block / padded batch: blocks of <=512 rows, >=2 blocks once
    b >= 256 (so both v7x TensorCores get work), rows rounded up to 16 so the
    bf16 input and f32 output blocks stay sublane-aligned and padding waste is
    bounded for awkward batch sizes."""
    n_blocks = max(1, -(-b // 512))
    if b >= 256 and n_blocks < 2:
        n_blocks = 2
    rows = -(-b // n_blocks)
    tb = -(-rows // 16) * 16
    return tb, n_blocks * tb


def dynamics_forward(x_nchw, kargs, r_dim):
    b, cin = x_nchw.shape[0], x_nchw.shape[1]
    n_layers, dp = kargs['w'].shape[0], kargs['w'].shape[-1]
    d_in = 9 * cin
    assert d_in <= IN_LANES and 27 + r_dim <= OUT_LANES

    tb, b_pad = _choose_batch_tiling(b)

    # NCHW -> (B, 9*Cin) position-major / channel-minor, bf16, padded to
    # (B_pad, 128) in one shot (no over-padded f32 round-trip).
    xf = jnp.transpose(x_nchw, (0, 2, 3, 1)).reshape(b, d_in).astype(jnp.bfloat16)
    x_pad = jnp.pad(xf, ((0, b_pad - b), (0, IN_LANES - d_in)))

    flops = int(2 * b_pad * dp * (IN_LANES + (n_layers - 2) * dp + OUT_LANES))
    bytes_acc = int(x_pad.size * 2 + b_pad * OUT_LANES * 4
                    + kargs['w'].size * 2 + kargs['t'].size * 4)

    out = pl.pallas_call(
        _dynamics_kernel,
        out_shape=jax.ShapeDtypeStruct((b_pad, OUT_LANES), jnp.float32),
        grid=(b_pad // tb,),
        in_specs=[
            pl.BlockSpec((tb, IN_LANES), lambda i: (i, 0)),          # activations
            pl.BlockSpec((n_layers, dp, dp), lambda i: (0, 0, 0)),   # weights (resident)
            pl.BlockSpec((n_layers, 1, dp), lambda i: (0, 0, 0)),    # BN shift
        ],
        out_specs=pl.BlockSpec((tb, OUT_LANES), lambda i: (i, 0)),
        compiler_params=pltpu.CompilerParams(
            dimension_semantics=("parallel",),
            vmem_limit_bytes=32 * 1024 * 1024),
        cost_estimate=pl.CostEstimate(flops=flops, transcendentals=0,
                                      bytes_accessed=bytes_acc),
    )(x_pad, kargs['w'], kargs['t'])

    e = out[:b, :27].reshape(b, 3, 3, 3)               # (b, y, x, c)
    state = jnp.transpose(e, (0, 3, 1, 2))             # NCHW
    reward = out[:b, 27:27 + r_dim]
    return state, reward


# ---------------------------- pure-JAX reference ---------------------------- #
def reference_forward(x, p):
    def conv(h, w, bias=None):
        out = jax.lax.conv_general_dilated(h, w, (1, 1), ((1, 1), (1, 1)),
                                           dimension_numbers=('NCHW', 'OIHW', 'NCHW'))
        if bias is not None:
            out = out + bias[None, :, None, None]
        return out

    def bn(h, d):
        inv = d['gamma'] / jnp.sqrt(d['var'] + BN_EPS)
        return ((h - d['mean'][None, :, None, None]) * inv[None, :, None, None]
                + d['beta'][None, :, None, None])

    h = jax.nn.relu(bn(conv(x, p['w0'], p['b0']), p['bn0']))
    for blk in p['res']:
        res = h
        o = jax.nn.relu(bn(conv(h, blk['w1']), blk['bn1']))
        o = bn(conv(o, blk['w2']), blk['bn2'])
        h = jax.nn.relu(o + res)
    e = bn(conv(h, p['we'], p['be']), p['bne'])

    rc = jnp.einsum('bchw,oc->bohw', e, p['wrc'][:, :, 0, 0]) + p['brc'][None, :, None, None]
    rflat = rc.reshape(x.shape[0], 9)
    reward = rflat @ p['wl'].T + p['bl']
    return e, reward


if __name__ == "__main__":
    key = jax.random.PRNGKey(0)
    pkey, xkey = jax.random.split(key)

    B, HIDDEN, N_RES, R = 2, 32, 2, 1
    params = init_params(pkey, num_res=N_RES, hidden=HIDDEN, reward_support=R)
    x = jax.random.normal(xkey, (B, 4, 3, 3), jnp.float32)       # NCHW, TicTacToe 3x3

    kargs = prepare_kernel_args(params)                          # batch-independent
    fwd = jax.jit(dynamics_forward, static_argnames=("r_dim",))
    state, reward = fwd(x, kargs, r_dim=R)
    jax.block_until_ready((state, reward))

    state_ref, reward_ref = reference_forward(x, params)
    # bf16 matmul operands (f32 accumulation) + BN scale folded into bf16
    # weights -> looser tolerance than pure f32.
    np.testing.assert_allclose(np.asarray(state), np.asarray(state_ref),
                               atol=5e-2, rtol=5e-2)
    np.testing.assert_allclose(np.asarray(reward), np.asarray(reward_ref),
                               atol=5e-2, rtol=5e-2)

    print("KERNEL_OK")
</pallas_src>

<mosaic_0001>
module attributes {stable_mosaic.version = 11 : i64} {
  func.func @_dynamics_kernel(%arg0: i32, %arg1: memref<16x128xbf16, #tpu.memory_space<vmem>>, %arg2: memref<6x384x384xbf16, #tpu.memory_space<vmem>>, %arg3: memref<6x1x384xf32, #tpu.memory_space<vmem>>, %arg4: memref<16x128xf32, #tpu.memory_space<vmem>>) attributes {dimension_semantics = [#tpu.dimension_semantics<parallel>], iteration_bounds = array<i64: 1>, scalar_prefetch = 0 : i64, scratch_operands = 0 : i64, tpu.core_type = #tpu.core_type<tc>, window_params = [{transform_indices = @transform_0, window_bounds = array<i64: 16, 128>}, {pipeline_mode = #tpu.pipeline_mode<synchronous>, transform_indices = @transform_1, window_bounds = array<i64: 6, 384, 384>}, {pipeline_mode = #tpu.pipeline_mode<synchronous>, transform_indices = @transform_2, window_bounds = array<i64: 6, 1, 384>}, {transform_indices = @transform_3, window_bounds = array<i64: 16, 128>}]} {
    %c0 = arith.constant 0 : index
    %c0_0 = arith.constant 0 : index
    %0 = vector.load %arg1[%c0, %c0_0] : memref<16x128xbf16, #tpu.memory_space<vmem>>, vector<16x128xbf16>
    %c0_1 = arith.constant 0 : index
    %c0_2 = arith.constant 0 : index
    %c0_3 = arith.constant 0 : index
    %1 = vector.load %arg2[%c0_1, %c0_2, %c0_3] : memref<6x384x384xbf16, #tpu.memory_space<vmem>>, vector<1x128x384xbf16>
    %2 = vector.shape_cast %1 : vector<1x128x384xbf16> to vector<128x384xbf16>
    %cst = arith.constant dense<0.000000e+00> : vector<16x384xf32>
    %3 = tpu.matmul %0, %2, %cst {dimension_numbers = #tpu.dot_dimension_numbers<[1], [0], [0], [1], [0, 0, 1, 1], [], []>} : vector<16x128xbf16>, vector<128x384xbf16>, vector<16x384xf32> -> vector<16x384xf32>
    %c0_4 = arith.constant 0 : index
    %c0_5 = arith.constant 0 : index
    %c0_6 = arith.constant 0 : index
    %4 = vector.load %arg3[%c0_4, %c0_5, %c0_6] : memref<6x1x384xf32, #tpu.memory_space<vmem>>, vector<1x1x384xf32>
    %5 = vector.shape_cast %4 : vector<1x1x384xf32> to vector<1x384xf32>
    %6 = vector.broadcast %5 : vector<1x384xf32> to vector<16x384xf32>
    %7 = arith.addf %3, %6 : vector<16x384xf32>
    %cst_7 = arith.constant 0.000000e+00 : f32
    %8 = vector.broadcast %cst_7 : f32 to vector<16x384xf32>
    %9 = arith.maximumf %7, %8 : vector<16x384xf32>
    %10 = arith.truncf %9 : vector<16x384xf32> to vector<16x384xbf16>
    %c1 = arith.constant 1 : index
    %c0_8 = arith.constant 0 : index
    %c0_9 = arith.constant 0 : index
    %11 = vector.load %arg2[%c1, %c0_8, %c0_9] : memref<6x384x384xbf16, #tpu.memory_space<vmem>>, vector<1x384x384xbf16>
    %12 = vector.shape_cast %11 : vector<1x384x384xbf16> to vector<384x384xbf16>
    %cst_10 = arith.constant dense<0.000000e+00> : vector<16x384xf32>
    %13 = tpu.matmul %10, %12, %cst_10 {dimension_numbers = #tpu.dot_dimension_numbers<[1], [0], [0], [1], [0, 0, 1, 1], [], []>} : vector<16x384xbf16>, vector<384x384xbf16>, vector<16x384xf32> -> vector<16x384xf32>
    %c1_11 = arith.constant 1 : index
    %c0_12 = arith.constant 0 : index
    %c0_13 = arith.constant 0 : index
    %14 = vector.load %arg3[%c1_11, %c0_12, %c0_13] : memref<6x1x384xf32, #tpu.memory_space<vmem>>, vector<1x1x384xf32>
    %15 = vector.shape_cast %14 : vector<1x1x384xf32> to vector<1x384xf32>
    %16 = vector.broadcast %15 : vector<1x384xf32> to vector<16x384xf32>
    %17 = arith.addf %13, %16 : vector<16x384xf32>
    %cst_14 = arith.constant 0.000000e+00 : f32
    %18 = vector.broadcast %cst_14 : f32 to vector<16x384xf32>
    %19 = arith.maximumf %17, %18 : vector<16x384xf32>
    %20 = arith.truncf %19 : vector<16x384xf32> to vector<16x384xbf16>
    %c2 = arith.constant 2 : index
    %c0_15 = arith.constant 0 : index
    %c0_16 = arith.constant 0 : index
    %21 = vector.load %arg2[%c2, %c0_15, %c0_16] : memref<6x384x384xbf16, #tpu.memory_space<vmem>>, vector<1x384x384xbf16>
    %22 = vector.shape_cast %21 : vector<1x384x384xbf16> to vector<384x384xbf16>
    %cst_17 = arith.constant dense<0.000000e+00> : vector<16x384xf32>
    %23 = tpu.matmul %20, %22, %cst_17 {dimension_numbers = #tpu.dot_dimension_numbers<[1], [0], [0], [1], [0, 0, 1, 1], [], []>} : vector<16x384xbf16>, vector<384x384xbf16>, vector<16x384xf32> -> vector<16x384xf32>
    %c2_18 = arith.constant 2 : index
    %c0_19 = arith.constant 0 : index
    %c0_20 = arith.constant 0 : index
    %24 = vector.load %arg3[%c2_18, %c0_19, %c0_20] : memref<6x1x384xf32, #tpu.memory_space<vmem>>, vector<1x1x384xf32>
    %25 = vector.shape_cast %24 : vector<1x1x384xf32> to vector<1x384xf32>
    %26 = vector.broadcast %25 : vector<1x384xf32> to vector<16x384xf32>
    %27 = arith.addf %23, %26 : vector<16x384xf32>
    %28 = arith.addf %27, %9 : vector<16x384xf32>
    %cst_21 = arith.constant 0.000000e+00 : f32
    %29 = vector.broadcast %cst_21 : f32 to vector<16x384xf32>
    %30 = arith.maximumf %28, %29 : vector<16x384xf32>
    %31 = arith.truncf %30 : vector<16x384xf32> to vector<16x384xbf16>
    %c3 = arith.constant 3 : index
    %c0_22 = arith.constant 0 : index
    %c0_23 = arith.constant 0 : index
    %32 = vector.load %arg2[%c3, %c0_22, %c0_23] : memref<6x384x384xbf16, #tpu.memory_space<vmem>>, vector<1x384x384xbf16>
    %33 = vector.shape_cast %32 : vector<1x384x384xbf16> to vector<384x384xbf16>
    %cst_24 = arith.constant dense<0.000000e+00> : vector<16x384xf32>
    %34 = tpu.matmul %31, %33, %cst_24 {dimension_numbers = #tpu.dot_dimension_numbers<[1], [0], [0], [1], [0, 0, 1, 1], [], []>} : vector<16x384xbf16>, vector<384x384xbf16>, vector<16x384xf32> -> vector<16x384xf32>
    %c3_25 = arith.constant 3 : index
    %c0_26 = arith.constant 0 : index
    %c0_27 = arith.constant 0 : index
    %35 = vector.load %arg3[%c3_25, %c0_26, %c0_27] : memref<6x1x384xf32, #tpu.memory_space<vmem>>, vector<1x1x384xf32>
    %36 = vector.shape_cast %35 : vector<1x1x384xf32> to vector<1x384xf32>
    %37 = vector.broadcast %36 : vector<1x384xf32> to vector<16x384xf32>
    %38 = arith.addf %34, %37 : vector<16x384xf32>
    %cst_28 = arith.constant 0.000000e+00 : f32
    %39 = vector.broadcast %cst_28 : f32 to vector<16x384xf32>
    %40 = arith.maximumf %38, %39 : vector<16x384xf32>
    %41 = arith.truncf %40 : vector<16x384xf32> to vector<16x384xbf16>
    %c4 = arith.constant 4 : index
    %c0_29 = arith.constant 0 : index
    %c0_30 = arith.constant 0 : index
    %42 = vector.load %arg2[%c4, %c0_29, %c0_30] : memref<6x384x384xbf16, #tpu.memory_space<vmem>>, vector<1x384x384xbf16>
    %43 = vector.shape_cast %42 : vector<1x384x384xbf16> to vector<384x384xbf16>
    %cst_31 = arith.constant dense<0.000000e+00> : vector<16x384xf32>
    %44 = tpu.matmul %41, %43, %cst_31 {dimension_numbers = #tpu.dot_dimension_numbers<[1], [0], [0], [1], [0, 0, 1, 1], [], []>} : vector<16x384xbf16>, vector<384x384xbf16>, vector<16x384xf32> -> vector<16x384xf32>
    %c4_32 = arith.constant 4 : index
    %c0_33 = arith.constant 0 : index
    %c0_34 = arith.constant 0 : index
    %45 = vector.load %arg3[%c4_32, %c0_33, %c0_34] : memref<6x1x384xf32, #tpu.memory_space<vmem>>, vector<1x1x384xf32>
    %46 = vector.shape_cast %45 : vector<1x1x384xf32> to vector<1x384xf32>
    %47 = vector.broadcast %46 : vector<1x384xf32> to vector<16x384xf32>
    %48 = arith.addf %44, %47 : vector<16x384xf32>
    %49 = arith.addf %48, %30 : vector<16x384xf32>
    %cst_35 = arith.constant 0.000000e+00 : f32
    %50 = vector.broadcast %cst_35 : f32 to vector<16x384xf32>
    %51 = arith.maximumf %49, %50 : vector<16x384xf32>
    %52 = arith.truncf %51 : vector<16x384xf32> to vector<16x384xbf16>
    %c5 = arith.constant 5 : index
    %c0_36 = arith.constant 0 : index
    %c0_37 = arith.constant 0 : index
    %53 = vector.load %arg2[%c5, %c0_36, %c0_37] : memref<6x384x384xbf16, #tpu.memory_space<vmem>>, vector<1x384x128xbf16>
    %54 = vector.shape_cast %53 : vector<1x384x128xbf16> to vector<384x128xbf16>
    %cst_38 = arith.constant dense<0.000000e+00> : vector<16x128xf32>
    %55 = tpu.matmul %52, %54, %cst_38 {dimension_numbers = #tpu.dot_dimension_numbers<[1], [0], [0], [1], [0, 0, 1, 1], [], []>} : vector<16x384xbf16>, vector<384x128xbf16>, vector<16x128xf32> -> vector<16x128xf32>
    %c5_39 = arith.constant 5 : index
    %c0_40 = arith.constant 0 : index
    %c0_41 = arith.constant 0 : index
    %56 = vector.load %arg3[%c5_39, %c0_40, %c0_41] : memref<6x1x384xf32, #tpu.memory_space<vmem>>, vector<1x1x128xf32>
    %57 = vector.shape_cast %56 : vector<1x1x128xf32> to vector<1x128xf32>
    %58 = vector.broadcast %57 : vector<1x128xf32> to vector<16x128xf32>
    %59 = arith.addf %55, %58 : vector<16x128xf32>
    %c0_42 = arith.constant 0 : index
    %c0_43 = arith.constant 0 : index
    %60 = vector.load %arg4[%c0_42, %c0_43] : memref<16x128xf32, #tpu.memory_space<vmem>>, vector<16x128xf32>
    tpu.vector_store %arg4[%c0_42, %c0_43], %59 {strides = array<i32>} : memref<16x128xf32, #tpu.memory_space<vmem>>, vector<16x128xf32>,
    return
  }
  func.func @transform_0(%arg0: i32) -> (i32, i32) {
    %c0_i32 = arith.constant 0 : i32
    %c0_i32_0 = arith.constant 0 : i32
    return %arg0, %c0_i32 : i32, i32
  }
  func.func @transform_1(%arg0: i32) -> (i32, i32, i32) {
    %c0_i32 = arith.constant 0 : i32
    %c0_i32_0 = arith.constant 0 : i32
    %c0_i32_1 = arith.constant 0 : i32
    %c0_i32_2 = arith.constant 0 : i32
    return %c0_i32, %c0_i32_0, %c0_i32_1 : i32, i32, i32
  }
  func.func @transform_2(%arg0: i32) -> (i32, i32, i32) {
    %c0_i32 = arith.constant 0 : i32
    %c0_i32_0 = arith.constant 0 : i32
    %c0_i32_1 = arith.constant 0 : i32
    %c0_i32_2 = arith.constant 0 : i32
    return %c0_i32, %c0_i32_0, %c0_i32_1 : i32, i32, i32
  }
  func.func @transform_3(%arg0: i32) -> (i32, i32) {
    %c0_i32 = arith.constant 0 : i32
    %c0_i32_0 = arith.constant 0 : i32
    return %arg0, %c0_i32 : i32, i32
  }
}

</mosaic_0001>

<bundles_post_ra>
// kernel: dynamics_forward.1
= control target key start
LH: loop header
LB: loop body
LE: loop exit
PB: predicated region body
PF: predicated region fallthrough
CT: control target
= control target key end

     0   :  { %8 = vsyncpa [#allocation3], 0  ;;  %s4963_s0 = inlined_call_operand.vmem [shape: bf16[16,128], index: 0, kind: input, shape index: {}]   ;;  %s4964_s1 = inlined_call_operand.hbm [shape: bf16[6,384,384], index: 1, kind: input, shape index: {}]   ;;  %s4965_s2 = inlined_call_operand.hbm [shape: f32[6,1,384], index: 2, kind: input, shape index: {}]   ;;  %s4966_s3 = inlined_call_operand.vmem [shape: f32[16,128], index: 3, kind: output, shape index: {}]  }
   0x1   :  { %s16_s14 = sshll.u32 %s4964_s1, 4  ;;  %s17_s14 = int_to_ptr.hbm [resolvable:$true] %s16_s14 }
   0x2   :  { %9 = vsyncpa [#allocation5], 0  ;;  %s4777_s15 = smov [#allocation2]   ;;  %s29_s19 = sshll.u32 %s4965_s2, 4  ;;  %s30_s19 = int_to_ptr.hbm [resolvable:$true] %s29_s19 }
   0x3   :  { %s18_s16 = sshll.u32 %s4777_s15, 4  ;;  %s4778_s20 = smov 192   ;;  %s19_s16 = int_to_ptr.vmem [resolvable:$true] %s18_s16 }
   0x4   :  { %s4779_s21 = smov 12   ;;  %s4780_s22 = smov [#allocation4]  }
   0x5   :  { %24 = dma.hbm_to_vmem [thread:$0]  %s17_s14, 55296, %s19_s16, [#allocation3], %s4778_s20, %s4778_s20, %s4779_s21  }
   0x6   :  { %s31_s23 = sshll.u32 %s4780_s22, 4  ;;  %s4781_s24 = smov 48   ;;  %s32_s23 = int_to_ptr.vmem [resolvable:$true] %s31_s23 }
   0x7   :  { %s4782_s25 = smov 3  }
   0x8   :  { %37 = dma.hbm_to_vmem [thread:$0]  %s30_s19, 288, %s32_s23, [#allocation5], %s4781_s24, %s4781_s24, %s4782_s25  }
   0x9   :  { %4773 = dma.done.wait [#allocation3], 55296  }
   0xa   :  { %4774 = vsyncadd [#allocation3], 4294912000 }
   0xb   :  { %4775 = dma.done.wait [#allocation5], 288  }
   0xc   :  { %4776 = vsyncadd [#allocation5], 4294967008  ;;  %v3123_v0 = vld [vmem:[#allocation2 + $0xa8] sm:$0xf]  ;;  %v4404_v1 = vld [vmem:[#allocation2 + $0xb0] sm:$0xf0] }
   0xd   :  { %v4403_v2 = vld [vmem:[#allocation2 + $0xac] sm:$0xf]  ;;  %v3124_v3 = vor.u32 %v4404_v1, %v3123_v0  ;;  %v3125_v4 = vld [vmem:[#allocation2 + $0xb4] sm:$0xf0]  ;;  %v3131_v5 = vld [vmem:[#allocation2 + $0xb0] sm:$0xf] }
   0xe   :  { %v4405_v6 = vld [vmem:[#allocation2 + $0xb8] sm:$0xf0]  ;;  %v3128_v7 = vor.u32 %v4403_v2, %v3125_v4  ;;  %v3111_v9 = vld [vmem:[#allocation2 + $0x90] sm:$0xf]  ;;  %v4400_v11 = vld [vmem:[#allocation2 + $0x94] sm:$0xf] }
   0xf   :  { %v3132_v8 = vor.u32 %v4405_v6, %v3131_v5  ;;  %v4401_v10 = vld [vmem:[#allocation2 + $0x98] sm:$0xf0]  ;;  %222 = vmatpush.bf16.msra.mxu0 %v3124_v3  ;;  %v3113_v13 = vld [vmem:[#allocation2 + $0x9c] sm:$0xf0]  ;;  %v3119_v14 = vld [vmem:[#allocation2 + $0x98] sm:$0xf] }
  0x10   :  { %v3112_v12 = vor.u32 %v4401_v10, %v3111_v9  ;;  %v4402_v15 = vld [vmem:[#allocation2 + $0xa0] sm:$0xf0]  ;;  %236 = vmatpush.bf16.msra.mxu1 %v3128_v7  ;;  %v3116_v16 = vor.u32 %v4400_v11, %v3113_v13  ;;  %v3099_v18 = vld [vmem:[#allocation2 + $0x78] sm:$0xf]  ;;  %v4397_v20 = vld [vmem:[#allocation2 + $0x7c] sm:$0xf] }
  0x11   :  { %250 = vmatpush.bf16.msra.mxu2 %v3132_v8  ;;  %v3120_v17 = vor.u32 %v4402_v15, %v3119_v14  ;;  %v4398_v19 = vld [vmem:[#allocation2 + $0x80] sm:$0xf0]  ;;  %v3101_v21 = vld [vmem:[#allocation2 + $0x84] sm:$0xf0]  ;;  %v3107_v22 = vld [vmem:[#allocation2 + $0x80] sm:$0xf] }
  0x12   :  { %v4399_v23 = vld [vmem:[#allocation2 + $0x88] sm:$0xf0]  ;;  %v3100_v24 = vor.u32 %v4398_v19, %v3099_v18  ;;  %v3104_v25 = vor.u32 %v4397_v20, %v3101_v21  ;;  %v3087_v27 = vld [vmem:[#allocation2 + $0x60] sm:$0xf]  ;;  %v4394_v29 = vld [vmem:[#allocation2 + $0x64] sm:$0xf] }
  0x13   :  { %223 = vmatpush.bf16.msra.mxu0 %v3112_v12  ;;  %v3108_v26 = vor.u32 %v4399_v23, %v3107_v22  ;;  %v4395_v28 = vld [vmem:[#allocation2 + $0x68] sm:$0xf0]  ;;  %v3089_v30 = vld [vmem:[#allocation2 + $0x6c] sm:$0xf0]  ;;  %v3095_v31 = vld [vmem:[#allocation2 + $0x68] sm:$0xf] }
  0x14   :  { %237 = vmatpush.bf16.msra.mxu1 %v3116_v16  ;;  %v4396_v32 = vld [vmem:[#allocation2 + $0x70] sm:$0xf0]  ;;  %v3088_v33 = vor.u32 %v4395_v28, %v3087_v27  ;;  %v3092_v34 = vor.u32 %v4394_v29, %v3089_v30  ;;  %v3075_v36 = vld [vmem:[#allocation2 + $0x48] sm:$0xf]  ;;  %v4391_v38 = vld [vmem:[#allocation2 + $0x4c] sm:$0xf] }
  0x15   :  { %251 = vmatpush.bf16.msra.mxu2 %v3120_v17  ;;  %v3096_v35 = vor.u32 %v4396_v32, %v3095_v31  ;;  %v4392_v37 = vld [vmem:[#allocation2 + $0x50] sm:$0xf0]  ;;  %v3077_v39 = vld [vmem:[#allocation2 + $0x54] sm:$0xf0]  ;;  %v3083_v40 = vld [vmem:[#allocation2 + $0x50] sm:$0xf] }
  0x16   :  { %v4393_v41 = vld [vmem:[#allocation2 + $0x58] sm:$0xf0]  ;;  %v3063_v42 = vld [vmem:[#allocation2 + $0x30] sm:$0xf]  ;;  %v3076_v43 = vor.u32 %v4392_v37, %v3075_v36  ;;  %v4388_v45 = vld [vmem:[#allocation2 + $0x34] sm:$0xf]  ;;  %v3080_v47 = vor.u32 %v4391_v38, %v3077_v39 }
  0x17   :  { %224 = vmatpush.bf16.msra.mxu0 %v3100_v24  ;;  %v4389_v44 = vld [vmem:[#allocation2 + $0x38] sm:$0xf0]  ;;  %v3065_v46 = vld [vmem:[#allocation2 + $0x3c] sm:$0xf0]  ;;  %v3084_v48 = vor.u32 %v4393_v41, %v3083_v40  ;;  %v3071_v49 = vld [vmem:[#allocation2 + $0x38] sm:$0xf] }
  0x18   :  { %238 = vmatpush.bf16.msra.mxu1 %v3104_v25  ;;  %v3219_v50 = vld [vmem:[#allocation2 + $0x2e8] sm:$0xf]  ;;  %v4428_v51 = vld [vmem:[#allocation2 + $0x2f0] sm:$0xf0]  ;;  %v4390_v52 = vld [vmem:[#allocation2 + $0x40] sm:$0xf0]  ;;  %v3064_v56 = vor.u32 %v4389_v44, %v3063_v42  ;;  %v3068_v60 = vor.u32 %v4388_v45, %v3065_v46 }
  0x19   :  { %252 = vmatpush.bf16.msra.mxu2 %v3108_v26  ;;  %v3220_v53 = vor.u32 %v4428_v51, %v3219_v50  ;;  %v3207_v54 = vld [vmem:[#allocation2 + $0x2d0] sm:$0xf]  ;;  %v4425_v55 = vld [vmem:[#allocation2 + $0x2d8] sm:$0xf0]  ;;  %v3051_v57 = vld [vmem:[#allocation2 + $0x18] sm:$0xf]  ;;  %v3072_v61 = vor.u32 %v4390_v52, %v3071_v49 }
  0x1a   :  { %v4386_v58 = vld [vmem:[#allocation2 + $0x20] sm:$0xf0]  ;;  %v3208_v59 = vor.u32 %v4425_v55, %v3207_v54  ;;  %v4385_v62 = vld [vmem:[#allocation2 + $0x1c] sm:$0xf]  ;;  %v3195_v63 = vld [vmem:[#allocation2 + $0x2b8] sm:$0xf] }
  0x1b   :  { %225 = vmatpush.bf16.msra.mxu0 %v3088_v33  ;;  %763 = vmatpush.bf16.msra.mxu3 %v3220_v53  ;;  %v4422_v0 = vld [vmem:[#allocation2 + $0x2c0] sm:$0xf0]  ;;  %v3053_v1 = vld [vmem:[#allocation2 + $0x24] sm:$0xf0]  ;;  %v3059_v2 = vld [vmem:[#allocation2 + $0x20] sm:$0xf]  ;;  %v3052_v4 = vor.u32 %v4386_v58, %v3051_v57 }
  0x1c   :  { %239 = vmatpush.bf16.msra.mxu1 %v3092_v34  ;;  %v4387_v3 = vld [vmem:[#allocation2 + $0x28] sm:$0xf0]  ;;  %v3039_v5 = vld [vmem:[#allocation2] sm:$0xf]  ;;  %v4382_v7 = vld [vmem:[#allocation2 + $0x4] sm:$0xf]  ;;  %v3196_v8 = vor.u32 %v4422_v0, %v3195_v63  ;;  %v3056_v9 = vor.u32 %v4385_v62, %v3053_v1 }
  0x1d   :  { %253 = vmatpush.bf16.msra.mxu2 %v3096_v35  ;;  %v4383_v6 = vld [vmem:[#allocation2 + $0x8] sm:$0xf0]  ;;  %v3060_v10 = vor.u32 %v4387_v3, %v3059_v2  ;;  %v3041_v11 = vld [vmem:[#allocation2 + $0xc] sm:$0xf0]  ;;  %v3183_v12 = vld [vmem:[#allocation2 + $0x2a0] sm:$0xf] }
  0x1e   :  { %v4419_v13 = vld [vmem:[#allocation2 + $0x2a8] sm:$0xf0]  ;;  %v3047_v14 = vld [vmem:[#allocation2 + $0x8] sm:$0xf]  ;;  %v4384_v15 = vld [vmem:[#allocation2 + $0x10] sm:$0xf0]  ;;  %v3040_v20 = vor.u32 %v4383_v6, %v3039_v5  ;;  %v3044_v24 = vor.u32 %v4382_v7, %v3041_v11 }
  0x1f   :  { %226 = vmatpush.bf16.msra.mxu0 %v3076_v43  ;;  %764 = vmatpush.bf16.msra.mxu3 %v3208_v59  ;;  %v3315_v16 = vld [vmem:[#allocation2 + $0x3a8] sm:$0xf]  ;;  %v4452_v17 = vld [vmem:[#allocation2 + $0x3b0] sm:$0xf0]  ;;  %v4427_v18 = vld [vmem:[#allocation2 + $0x2ec] sm:$0xf]  ;;  %v3184_v21 = vor.u32 %v4419_v13, %v3183_v12  ;;  %v3048_v25 = vor.u32 %v4384_v15, %v3047_v14 }
  0x20   :  { %240 = vmatpush.bf16.msra.mxu1 %v3080_v47  ;;  %v3221_v19 = vld [vmem:[#allocation2 + $0x2f4] sm:$0xf0]  ;;  %v3411_v22 = vld [vmem:[#allocation2 + $0x468] sm:$0xf]  ;;  %v4476_v23 = vld [vmem:[#allocation2 + $0x470] sm:$0xf0]  ;;  %v3316_v27 = vor.u32 %v4452_v17, %v3315_v16 }
  0x21   :  { %254 = vmatpush.bf16.msra.mxu2 %v3084_v48  ;;  %v4381_v26 = vld [vmem:[%s4963_s0] sm:$0xff]  ;;  %v3224_v28 = vor.u32 %v4427_v18, %v3221_v19  ;;  %v3171_v29 = vld [vmem:[#allocation2 + $0x288] sm:$0xf]  ;;  %v4416_v30 = vld [vmem:[#allocation2 + $0x290] sm:$0xf0]  ;;  %v3412_v35 = vor.u32 %v4476_v23, %v3411_v22 }
  0x22   :  { %v3303_v31 = vld [vmem:[#allocation2 + $0x390] sm:$0xf]  ;;  %v4449_v32 = vld [vmem:[#allocation2 + $0x398] sm:$0xf0]  ;;  %v4424_v33 = vld [vmem:[#allocation2 + $0x2d4] sm:$0xf]  ;;  %v3172_v38 = vor.u32 %v4416_v30, %v3171_v29 }
  0x23   :  { %227 = vmatpush.bf16.msra.mxu0 %v3064_v56  ;;  %765 = vmatpush.bf16.msra.mxu3 %v3196_v8  ;;  %v3209_v34 = vld [vmem:[#allocation2 + $0x2dc] sm:$0xf0]  ;;  %v3399_v36 = vld [vmem:[#allocation2 + $0x450] sm:$0xf]  ;;  %v4473_v37 = vld [vmem:[#allocation2 + $0x458] sm:$0xf0]  ;;  %v3304_v39 = vor.u32 %v4449_v32, %v3303_v31 }
  0x24   :  { %241 = vmatpush.bf16.msra.mxu1 %v3068_v60  ;;  %v3212_v40 = vor.u32 %v4424_v33, %v3209_v34  ;;  %v3159_v41 = vld [vmem:[#allocation2 + $0x270] sm:$0xf]  ;;  %v4413_v42 = vld [vmem:[#allocation2 + $0x278] sm:$0xf0]  ;;  %v3291_v43 = vld [vmem:[#allocation2 + $0x378] sm:$0xf]  ;;  %v3400_v47 = vor.u32 %v4473_v37, %v3399_v36 }
  0x25   :  { %255 = vmatpush.bf16.msra.mxu2 %v3072_v61  ;;  %v4446_v44 = vld [vmem:[#allocation2 + $0x380] sm:$0xf0]  ;;  %v4421_v45 = vld [vmem:[#allocation2 + $0x2bc] sm:$0xf]  ;;  %v3197_v46 = vld [vmem:[#allocation2 + $0x2c4] sm:$0xf0]  ;;  %v3160_v50 = vor.u32 %v4413_v42, %v3159_v41 }
  0x26   :  { %v3387_v48 = vld [vmem:[#allocation2 + $0x438] sm:$0xf]  ;;  %v4470_v49 = vld [vmem:[#allocation2 + $0x440] sm:$0xf0]  ;;  %v3292_v51 = vor.u32 %v4446_v44, %v3291_v43  ;;  %v3200_v52 = vor.u32 %v4421_v45, %v3197_v46  ;;  %v3279_v55 = vld [vmem:[#allocation2 + $0x360] sm:$0xf] }
  0x27   :  { %228 = vmatpush.bf16.msra.mxu0 %v3052_v4  ;;  %766 = vmatpush.bf16.msra.mxu3 %v3184_v21  ;;  %v3147_v53 = vld [vmem:[#allocation2 + $0x258] sm:$0xf]  ;;  %v4410_v54 = vld [vmem:[#allocation2 + $0x260] sm:$0xf0]  ;;  %v4443_v56 = vld [vmem:[#allocation2 + $0x368] sm:$0xf0]  ;;  %v3388_v59 = vor.u32 %v4470_v49, %v3387_v48 }
  0x28   :  { %242 = vmatpush.bf16.msra.mxu1 %v3056_v9  ;;  %v4418_v57 = vld [vmem:[#allocation2 + $0x2a4] sm:$0xf]  ;;  %v3185_v58 = vld [vmem:[#allocation2 + $0x2ac] sm:$0xf0]  ;;  %v3375_v60 = vld [vmem:[#allocation2 + $0x420] sm:$0xf]  ;;  %v3148_v62 = vor.u32 %v4410_v54, %v3147_v53  ;;  %v3280_v0 = vor.u32 %v4443_v56, %v3279_v55 }
  0x29   :  { %256 = vmatpush.bf16.msra.mxu2 %v3060_v10  ;;  %v4467_v61 = vld [vmem:[#allocation2 + $0x428] sm:$0xf0]  ;;  %v3135_v63 = vld [vmem:[#allocation2 + $0x240] sm:$0xf]  ;;  %v3188_v1 = vor.u32 %v4418_v57, %v3185_v58  ;;  %v3267_v3 = vld [vmem:[#allocation2 + $0x348] sm:$0xf] }
  0x2a   :  { %v4407_v2 = vld [vmem:[#allocation2 + $0x248] sm:$0xf0]  ;;  %v4440_v4 = vld [vmem:[#allocation2 + $0x350] sm:$0xf0]  ;;  %v3173_v6 = vld [vmem:[#allocation2 + $0x294] sm:$0xf0]  ;;  %v3376_v8 = vor.u32 %v4467_v61, %v3375_v60 }
  0x2b   :  { %229 = vmatpush.bf16.msra.mxu0 %v3040_v20  ;;  %767 = vmatpush.bf16.msra.mxu3 %v3172_v38  ;;  %v4415_v5 = vld [vmem:[#allocation2 + $0x28c] sm:$0xf]  ;;  %v3317_v9 = vld [vmem:[#allocation2 + $0x3b4] sm:$0xf0]  ;;  %v3363_v10 = vld [vmem:[#allocation2 + $0x408] sm:$0xf]  ;;  %v3136_v12 = vor.u32 %v4407_v2, %v3135_v63  ;;  %v3268_v13 = vor.u32 %v4440_v4, %v3267_v3 }
  0x2c   :  { %243 = vmatpush.bf16.msra.mxu1 %v3044_v24  ;;  %v4451_v7 = vld [vmem:[#allocation2 + $0x3ac] sm:$0xf]  ;;  %v4464_v11 = vld [vmem:[#allocation2 + $0x410] sm:$0xf0]  ;;  %v3176_v14 = vor.u32 %v4415_v5, %v3173_v6  ;;  %v3255_v15 = vld [vmem:[#allocation2 + $0x330] sm:$0xf] }
  0x2d   :  { %257 = vmatpush.bf16.msra.mxu2 %v3048_v25  ;;  %v4437_v16 = vld [vmem:[#allocation2 + $0x338] sm:$0xf0]  ;;  %v3320_v17 = vor.u32 %v4451_v7, %v3317_v9  ;;  %v4412_v18 = vld [vmem:[#allocation2 + $0x274] sm:$0xf]  ;;  %v3161_v19 = vld [vmem:[#allocation2 + $0x27c] sm:$0xf0]  ;;  %v3364_v21 = vor.u32 %v4464_v11, %v3363_v10 }
  0x2e   :  { %230 = vmatmul.bf16.vlgmr.msra.gmra.mxu0 %v4381_v26  ;;  %v4448_v20 = vld [vmem:[#allocation2 + $0x394] sm:$0xf]  ;;  %v3305_v22 = vld [vmem:[#allocation2 + $0x39c] sm:$0xf0]  ;;  %v3351_v23 = vld [vmem:[#allocation2 + $0x3f0] sm:$0xf]  ;;  %v3256_v25 = vor.u32 %v4437_v16, %v3255_v15 }
  0x2f   :  { %777 = vmatpush.bf16.msrb.mxu0 %v3316_v27  ;;  %244 = vmatmul.bf16.vlgmr.msra.gmra.mxu1 %v4381_v26  ;;  %v4461_v24 = vld [vmem:[#allocation2 + $0x3f8] sm:$0xf0]  ;;  %v3243_v27 = vld [vmem:[#allocation2 + $0x318] sm:$0xf]  ;;  %v4434_v29 = vld [vmem:[#allocation2 + $0x320] sm:$0xf0] }
  0x30   :  { %791 = vmatpush.bf16.msrb.mxu1 %v3412_v35  ;;  %258 = vmatmul.bf16.vlgmr.msra.gmra.mxu2 %v4381_v26  ;;  %v3164_v26 = vor.u32 %v4412_v18, %v3161_v19  ;;  %v4409_v30 = vld [vmem:[#allocation2 + $0x25c] sm:$0xf]  ;;  %v3149_v31 = vld [vmem:[#allocation2 + $0x264] sm:$0xf0]  ;;  %v3352_v32 = vor.u32 %v4461_v24, %v3351_v23  ;;  %v3244_v35 = vor.u32 %v4434_v29, %v3243_v27  ;;  %v3231_v37 = vld [vmem:[#allocation2 + $0x300] sm:$0xf] }
  0x31   :  { %805 = vmatpush.bf16.msrb.mxu2 %v3224_v28  ;;  %768 = vmatpush.bf16.msra.mxu3 %v3160_v50  ;;  %v3308_v28 = vor.u32 %v4448_v20, %v3305_v22  ;;  %v4445_v33 = vld [vmem:[#allocation2 + $0x37c] sm:$0xf]  ;;  %v3293_v34 = vld [vmem:[#allocation2 + $0x384] sm:$0xf0]  ;;  %v3152_v36 = vor.u32 %v4409_v30, %v3149_v31  ;;  %v3137_v41 = vld [vmem:[#allocation2 + $0x24c] sm:$0xf0] }
  0x32   :  { %v3296_v38 = vor.u32 %v4445_v33, %v3293_v34  ;;  %v4442_v42 = vld [vmem:[#allocation2 + $0x364] sm:$0xf]  ;;  %v3281_v43 = vld [vmem:[#allocation2 + $0x36c] sm:$0xf0]  ;;  %v3413_v48 = vld [vmem:[#allocation2 + $0x474] sm:$0xf0] }
  0x33   :  { %778 = vmatpush.bf16.msrb.mxu0 %v3304_v39  ;;  %v4431_v39 = vld [vmem:[#allocation2 + $0x308] sm:$0xf0]  ;;  %v3284_v46 = vor.u32 %v4442_v42, %v3281_v43  ;;  %v3323_v49 = vld [vmem:[#allocation2 + $0x3b0] sm:$0xf]  ;;  %v4458_v53 = vld [vmem:[#allocation2 + $0x3e0] sm:$0xf0] }
  0x34   :  { %792 = vmatpush.bf16.msrb.mxu1 %v3400_v47  ;;  %v3232_v44 = vor.u32 %v4431_v39, %v3231_v37  ;;  %v4475_v47 = vld [vmem:[#allocation2 + $0x46c] sm:$0xf]  ;;  %v3269_v57 = vld [vmem:[#allocation2 + $0x354] sm:$0xf0]  ;;  %v3401_v60 = vld [vmem:[#allocation2 + $0x45c] sm:$0xf0] }
  0x35   :  { %806 = vmatpush.bf16.msrb.mxu2 %v3212_v40  ;;  %769 = vmatpush.bf16.msra.mxu3 %v3148_v62  ;;  %v4406_v40 = vld [vmem:[#allocation2 + $0x244] sm:$0xf]  ;;  %v3416_v50 = vor.u32 %v4475_v47, %v3413_v48  ;;  %v4439_v56 = vld [vmem:[#allocation2 + $0x34c] sm:$0xf]  ;;  %v3311_v61 = vld [vmem:[#allocation2 + $0x398] sm:$0xf] }
  0x36   :  { %v3140_v45 = vor.u32 %v4406_v40, %v3137_v41  ;;  %v3272_v58 = vor.u32 %v4439_v56, %v3269_v57  ;;  %v4450_v63 = vld [vmem:[#allocation2 + $0x3a0] sm:$0xf0]  ;;  %v4455_v2 = vld [vmem:[#allocation2 + $0x3c8] sm:$0xf0]  ;;  %v3227_v3 = vld [vmem:[#allocation2 + $0x2f0] sm:$0xf] }
  0x37   :  { %779 = vmatpush.bf16.msrb.mxu0 %v3292_v51  ;;  %v4453_v51 = vld [vmem:[#allocation2 + $0x3b8] sm:$0xf0]  ;;  %v4436_v6 = vld [vmem:[#allocation2 + $0x334] sm:$0xf]  ;;  %v3257_v7 = vld [vmem:[#allocation2 + $0x33c] sm:$0xf0] }
  0x38   :  { %793 = vmatpush.bf16.msrb.mxu1 %v3388_v59  ;;  %v3324_v54 = vor.u32 %v4453_v51, %v3323_v49  ;;  %v4472_v59 = vld [vmem:[#allocation2 + $0x454] sm:$0xf]  ;;  %v4429_v5 = vld [vmem:[#allocation2 + $0x2f8] sm:$0xf0]  ;;  %v3260_v9 = vor.u32 %v4436_v6, %v3257_v7  ;;  %v3389_v11 = vld [vmem:[#allocation2 + $0x444] sm:$0xf0] }
  0x39   :  { %807 = vmatpush.bf16.msrb.mxu2 %v3200_v52  ;;  %770 = vmatpush.bf16.msra.mxu3 %v3136_v12  ;;  %v3339_v52 = vld [vmem:[#allocation2 + $0x3d8] sm:$0xf]  ;;  %v3404_v62 = vor.u32 %v4472_v59, %v3401_v60  ;;  %v4469_v10 = vld [vmem:[#allocation2 + $0x43c] sm:$0xf]  ;;  %v3299_v12 = vld [vmem:[#allocation2 + $0x380] sm:$0xf] }
  0x3a   :  { %v3340_v55 = vor.u32 %v4458_v53, %v3339_v52  ;;  %v3215_v16 = vld [vmem:[#allocation2 + $0x2d8] sm:$0xf]  ;;  %v4433_v19 = vld [vmem:[#allocation2 + $0x31c] sm:$0xf]  ;;  %v3245_v20 = vld [vmem:[#allocation2 + $0x324] sm:$0xf0] }
  0x3b   :  { %780 = vmatpush.bf16.msrb.mxu0 %v3280_v0  ;;  %v3327_v0 = vld [vmem:[#allocation2 + $0x3c0] sm:$0xf]  ;;  %v4466_v22 = vld [vmem:[#allocation2 + $0x424] sm:$0xf]  ;;  %v3377_v23 = vld [vmem:[#allocation2 + $0x42c] sm:$0xf0] }
  0x3c   :  { %794 = vmatpush.bf16.msrb.mxu1 %v3376_v8  ;;  %v3328_v4 = vor.u32 %v4455_v2, %v3327_v0  ;;  %v3228_v8 = vor.u32 %v4429_v5, %v3227_v3  ;;  %v3287_v24 = vld [vmem:[#allocation2 + $0x368] sm:$0xf]  ;;  %v4423_v29 = vld [vmem:[#allocation2 + $0x2c8] sm:$0xf0]  ;;  %v4430_v31 = vld [vmem:[#allocation2 + $0x304] sm:$0xf] }
  0x3d   :  { %808 = vmatpush.bf16.msrb.mxu2 %v3188_v1  ;;  %819 = vmatpush.bf16.msrb.mxu3 %v3320_v17  ;;  %v3312_v1 = vor.u32 %v4450_v63, %v3311_v61  ;;  %v4426_v17 = vld [vmem:[#allocation2 + $0x2e0] sm:$0xf0]  ;;  %v4463_v34 = vld [vmem:[#allocation2 + $0x40c] sm:$0xf]  ;;  %v3191_v40 = vld [vmem:[#allocation2 + $0x2a8] sm:$0xf] }
  0x3e   :  { %v3216_v18 = vor.u32 %v4426_v17, %v3215_v16  ;;  %v4420_v41 = vld [vmem:[#allocation2 + $0x2b0] sm:$0xf0]  ;;  %v4438_v47 = vld [vmem:[#allocation2 + $0x340] sm:$0xf0]  ;;  %v3179_v49 = vld [vmem:[#allocation2 + $0x290] sm:$0xf] }
  0x3f   :  { %781 = vmatpush.bf16.msrb.mxu0 %v3268_v13  ;;  %v3392_v13 = vor.u32 %v4469_v10, %v3389_v11  ;;  %v3192_v42 = vor.u32 %v4420_v41, %v3191_v40  ;;  %v4460_v43 = vld [vmem:[#allocation2 + $0x3f4] sm:$0xf]  ;;  %v4457_v52 = vld [vmem:[#allocation2 + $0x3dc] sm:$0xf]  ;;  %v3341_v53 = vld [vmem:[#allocation2 + $0x3e4] sm:$0xf0] }
  0x40   :  { %795 = vmatpush.bf16.msrb.mxu1 %v3364_v21  ;;  %v3248_v21 = vor.u32 %v4433_v19, %v3245_v20  ;;  %v4435_v56 = vld [vmem:[#allocation2 + $0x328] sm:$0xf0]  ;;  %v4414_v59 = vld [vmem:[#allocation2 + $0x280] sm:$0xf0]  ;;  %v3239_v63 = vld [vmem:[#allocation2 + $0x308] sm:$0xf] }
  0x41   :  { %809 = vmatpush.bf16.msrb.mxu2 %v3176_v14  ;;  %820 = vmatpush.bf16.msrb.mxu3 %v3308_v28  ;;  %v4447_v14 = vld [vmem:[#allocation2 + $0x388] sm:$0xf0]  ;;  %v3203_v28 = vld [vmem:[#allocation2 + $0x2c0] sm:$0xf]  ;;  %v4454_v60 = vld [vmem:[#allocation2 + $0x3c4] sm:$0xf] }
  0x42   :  { %v3300_v15 = vor.u32 %v4447_v14, %v3299_v12  ;;  %v3204_v30 = vor.u32 %v4423_v29, %v3203_v28  ;;  %v4432_v0 = vld [vmem:[#allocation2 + $0x310] sm:$0xf0]  ;;  %v3155_v3 = vld [vmem:[#allocation2 + $0x260] sm:$0xf] }
  0x43   :  { %782 = vmatpush.bf16.msrb.mxu0 %v3256_v25  ;;  %v3380_v25 = vor.u32 %v4466_v22, %v3377_v23  ;;  %v3240_v2 = vor.u32 %v4432_v0, %v3239_v63  ;;  %v80_v6 = vld [vmem:[#allocation4] sm:$0x7]  ;;  %v4477_v22 = vld [vmem:[#allocation2 + $0x478] sm:$0xf0]  ;;  %v3459_v63 = vld [vmem:[#allocation2 + $0x4c8] sm:$0xf] }
  0x44   :  { %796 = vmatpush.bf16.msrb.mxu1 %v3352_v32  ;;  %v3233_v32 = vld [vmem:[#allocation2 + $0x30c] sm:$0xf0]  ;;  %v83_v12 = vperm.slane %v80_v6, 1  ;;  %v84_v17 = vperm.slane %v80_v6, 2  ;;  %v4488_v0 = vld [vmem:[#allocation2 + $0x4d0] sm:$0xf0] }
  0x45   :  { %810 = vmatpush.bf16.msrb.mxu2 %v3164_v26  ;;  %821 = vmatpush.bf16.msrb.mxu3 %v3296_v38  ;;  %v4444_v26 = vld [vmem:[#allocation2 + $0x370] sm:$0xf0]  ;;  %v3236_v33 = vor.u32 %v4430_v31, %v3233_v32  ;;  %v4441_v38 = vld [vmem:[#allocation2 + $0x358] sm:$0xf0]  ;;  %v3407_v31 = vld [vmem:[#allocation2 + $0x458] sm:$0xf] }
  0x46   :  { %v3288_v27 = vor.u32 %v4444_v26, %v3287_v24  ;;  %v4474_v32 = vld [vmem:[#allocation2 + $0x460] sm:$0xf0] }
  0x47   :  { %783 = vmatpush.bf16.msrb.mxu0 %v3244_v35  ;;  %v3365_v35 = vld [vmem:[#allocation2 + $0x414] sm:$0xf0]  ;;  %v3408_v40 = vor.u32 %v4474_v32, %v3407_v31  ;;  %v3423_v32 = vld [vmem:[#allocation2 + $0x480] sm:$0xf] }
  0x48   :  { %797 = vmatpush.bf16.msrb.mxu1 %v3340_v55  ;;  %v3368_v37 = vor.u32 %v4463_v34, %v3365_v35  ;;  %v3344_v55 = vor.u32 %v4457_v52, %v3341_v53  ;;  %v3507_v35 = vld [vmem:[#allocation2 + $0x528] sm:$0xf]  ;;  %v4468_v52 = vld [vmem:[#allocation2 + $0x430] sm:$0xf0] }
  0x49   :  { %811 = vmatpush.bf16.msrb.mxu2 %v3152_v36  ;;  %822 = vmatpush.bf16.msrb.mxu3 %v3284_v46  ;;  %v3275_v36 = vld [vmem:[#allocation2 + $0x350] sm:$0xf] }
  0x4a   :  { %v3276_v39 = vor.u32 %v4441_v38, %v3275_v36  ;;  %v4500_v36 = vld [vmem:[#allocation2 + $0x530] sm:$0xf0] }
  0x4b   :  { %784 = vmatpush.bf16.msrb.mxu0 %v3232_v44  ;;  %v3353_v44 = vld [vmem:[#allocation2 + $0x3fc] sm:$0xf0]  ;;  %v3508_v41 = vor.u32 %v4500_v36, %v3507_v35  ;;  %v4523_v35 = vld [vmem:[#allocation2 + $0x5ec] sm:$0xf]  ;;  %v3605_v36 = vld [vmem:[#allocation2 + $0x5f4] sm:$0xf0] }
  0x4c   :  { %798 = vmatpush.bf16.msrb.mxu1 %v3328_v4  ;;  %v3356_v46 = vor.u32 %v4460_v43, %v3353_v44  ;;  %v4411_v4 = vld [vmem:[#allocation2 + $0x268] sm:$0xf0]  ;;  %v3395_v43 = vld [vmem:[#allocation2 + $0x440] sm:$0xf] }
  0x4d   :  { %812 = vmatpush.bf16.msrb.mxu2 %v3140_v45  ;;  %823 = vmatpush.bf16.msrb.mxu3 %v3272_v58  ;;  %v3263_v45 = vld [vmem:[#allocation2 + $0x338] sm:$0xf]  ;;  %v3156_v5 = vor.u32 %v4411_v4, %v3155_v3  ;;  %v4471_v44 = vld [vmem:[#allocation2 + $0x448] sm:$0xf0]  ;;  %v4462_v3 = vld [vmem:[#allocation2 + $0x400] sm:$0xf0] }
  0x4e   :  { %v3264_v48 = vor.u32 %v4438_v47, %v3263_v45  ;;  %v3167_v58 = vld [vmem:[#allocation2 + $0x278] sm:$0xf]  ;;  %v3591_v4 = vld [vmem:[#allocation2 + $0x5d0] sm:$0xf] }
  0x4f   :  { %833 = vmatpush.bf16.msra.mxu0 %v3416_v50  ;;  %v4417_v50 = vld [vmem:[#allocation2 + $0x298] sm:$0xf0]  ;;  %v3168_v61 = vor.u32 %v4414_v59, %v3167_v58  ;;  %v3483_v47 = vld [vmem:[#allocation2 + $0x4f8] sm:$0xf]  ;;  %v3603_v59 = vld [vmem:[#allocation2 + $0x5e8] sm:$0xf] }
  0x50   :  { %847 = vmatpush.bf16.msra.mxu1 %v3228_v8  ;;  %v3180_v51 = vor.u32 %v4417_v50, %v3179_v49  ;;  %v3143_v8 = vld [vmem:[#allocation2 + $0x248] sm:$0xf]  ;;  %v3396_v50 = vor.u32 %v4471_v44, %v3395_v43  ;;  %v4465_v58 = vld [vmem:[#allocation2 + $0x418] sm:$0xf0]  ;;  %v3608_v43 = vor.u32 %v4523_v35, %v3605_v36  ;;  %v4511_v35 = vld [vmem:[#allocation2 + $0x58c] sm:$0xf] }
  0x51   :  { %861 = vmatpush.bf16.msra.mxu2 %v3324_v54  ;;  %824 = vmatpush.bf16.msrb.mxu3 %v3260_v9  ;;  %v3251_v54 = vld [vmem:[#allocation2 + $0x320] sm:$0xf]  ;;  %v4408_v9 = vld [vmem:[#allocation2 + $0x250] sm:$0xf0] }
  0x52   :  { %v3252_v57 = vor.u32 %v4435_v56, %v3251_v54  ;;  %v3144_v11 = vor.u32 %v4408_v9, %v3143_v8  ;;  %v3471_v54 = vld [vmem:[#allocation2 + $0x4e0] sm:$0xf]  ;;  %v4485_v8 = vld [vmem:[#allocation2 + $0x4b8] sm:$0xf0] }
  0x53   :  { %834 = vmatpush.bf16.msra.mxu0 %v3404_v62  ;;  %v3329_v62 = vld [vmem:[#allocation2 + $0x3cc] sm:$0xf0] }
  0x54   :  { %848 = vmatpush.bf16.msra.mxu1 %v3216_v18 }
  0x55   :  { %862 = vmatpush.bf16.msra.mxu2 %v3312_v1  ;;  %825 = vmatpush.bf16.msrb.mxu3 %v3248_v21  ;;  %v3332_v1 = vor.u32 %v4454_v60, %v3329_v62  ;;  %v3419_v21 = vld [vmem:[#allocation2 + $0x470] sm:$0xf]  ;;  %v4524_v60 = vld [vmem:[#allocation2 + $0x5f0] sm:$0xf0] }
  0x56   :  { %v3420_v29 = vor.u32 %v4477_v22, %v3419_v21  ;;  %v3604_v62 = vor.u32 %v4524_v60, %v3603_v59  ;;  %v4456_v21 = vld [vmem:[#allocation2 + $0x3d0] sm:$0xf0]  ;;  %v4499_v22 = vld [vmem:[#allocation2 + $0x52c] sm:$0xf]  ;;  %v3593_v59 = vld [vmem:[#allocation2 + $0x5dc] sm:$0xf0] }
  0x57   :  { %835 = vmatpush.bf16.msra.mxu0 %v3392_v13  ;;  %v82_v13 = vperm.slane %v80_v6, 0  ;;  %v4521_v6 = vld [vmem:[#allocation2 + $0x5d8] sm:$0xf0] }
  0x58   :  { %849 = vmatpush.bf16.msra.mxu1 %v3204_v30  ;;  %v3592_v9 = vor.u32 %v4521_v6, %v3591_v4  ;;  %v4515_v6 = vld [vmem:[#allocation2 + $0x5a8] sm:$0xf0] }
  0x59   :  { %863 = vmatpush.bf16.msra.mxu2 %v3300_v15  ;;  %826 = vmatpush.bf16.msrb.mxu3 %v3236_v33 }
  0x5b   :  { %836 = vmatpush.bf16.msra.mxu0 %v3380_v25 }
  0x5c   :  { %850 = vmatpush.bf16.msra.mxu1 %v3192_v42  ;;  %v4497_v42 = vld [vmem:[#allocation2 + $0x518] sm:$0xf0] }
  0x5d   :  { %864 = vmatpush.bf16.msra.mxu2 %v3288_v27 }
  0x5f   :  { %837 = vmatpush.bf16.msra.mxu0 %v3368_v37  ;;  %v3495_v37 = vld [vmem:[#allocation2 + $0x510] sm:$0xf] }
  0x60   :  { %851 = vmatpush.bf16.msra.mxu1 %v3180_v51  ;;  %v3383_v51 = vld [vmem:[#allocation2 + $0x428] sm:$0xf] }
  0x61   :  { %865 = vmatpush.bf16.msra.mxu2 %v3276_v39  ;;  %v3384_v56 = vor.u32 %v4468_v52, %v3383_v51  ;;  %v4487_v52 = vld [vmem:[#allocation2 + $0x4cc] sm:$0xf] }
  0x63   :  { %838 = vmatpush.bf16.msra.mxu0 %v3356_v46  ;;  %v3496_v46 = vor.u32 %v4497_v42, %v3495_v37 }
  0x64   :  { %852 = vmatpush.bf16.msra.mxu1 %v3168_v61 }
  0x65   :  { %866 = vmatpush.bf16.msra.mxu2 %v3264_v48  ;;  %v4494_v48 = vld [vmem:[#allocation2 + $0x500] sm:$0xf0] }
  0x66   :  { %v3484_v53 = vor.u32 %v4494_v48, %v3483_v47  ;;  %v4490_v48 = vld [vmem:[#allocation2 + $0x4e4] sm:$0xf] }
  0x67   :  { %839 = vmatpush.bf16.msra.mxu0 %v3344_v55  ;;  %v4491_v55 = vld [vmem:[#allocation2 + $0x4e8] sm:$0xf0] }
  0x68   :  { %853 = vmatpush.bf16.msra.mxu1 %v3156_v5  ;;  %v3472_v61 = vor.u32 %v4491_v55, %v3471_v54  ;;  %v3460_v5 = vor.u32 %v4488_v0, %v3459_v63  ;;  %v4484_v55 = vld [vmem:[#allocation2 + $0x4b4] sm:$0xf]  ;;  %v3437_v0 = vld [vmem:[#allocation2 + $0x4a4] sm:$0xf0] }
  0x69   :  { %867 = vmatpush.bf16.msra.mxu2 %v3252_v57  ;;  %v3371_v57 = vld [vmem:[#allocation2 + $0x410] sm:$0xf] }
  0x6b   :  { %840 = vmatpush.bf16.msra.mxu0 %v3332_v1  ;;  %v3372_v1 = vor.u32 %v4465_v58, %v3371_v57  ;;  %v4520_v57 = vld [vmem:[#allocation2 + $0x5d4] sm:$0xf] }
  0x6c   :  { %854 = vmatpush.bf16.msra.mxu1 %v3144_v11  ;;  %v3347_v11 = vld [vmem:[#allocation2 + $0x3e0] sm:$0xf]  ;;  %v3596_v60 = vor.u32 %v4520_v57, %v3593_v59  ;;  %v3531_v57 = vld [vmem:[#allocation2 + $0x558] sm:$0xf] }
  0x6d   :  { %868 = vmatpush.bf16.msra.mxu2 %v3240_v2  ;;  %v3359_v2 = vld [vmem:[#allocation2 + $0x3f8] sm:$0xf] }
  0xab   :  { %v231_v7 = vpop.f32.mrf.mxu0 }
  0xac   :  { %v245_v10 = vpop.f32.mrf.mxu1  ;;  %v4814_v15 = vadd.f32 %v231_v7, %v82_v13  ;;  %v3447_v7 = vld [vmem:[#allocation2 + $0x4b0] sm:$0xf] }
  0xad   :  { %v4812_v14 = vadd.f32 %v245_v10, %v83_v12  ;;  %v3360_v10 = vor.u32 %v4462_v3, %v3359_v2  ;;  %v3581_v2 = vld [vmem:[#allocation2 + $0x5c4] sm:$0xf0] }
  0xae   :  { %v264_v25 = vmax.f32 %v4814_v15, 0.0 }
  0xaf   :  { %v265_v23 = vmax.f32 %v4812_v14, 0.0 }
  0xb3   :  { %v259_v16 = vpop.f32.mrf.mxu2  ;;  %v233_v18 = vpop.f32.mrf.mxu0 }
  0xb4   :  { %v4816_v19 = vadd.f32 %v233_v18, %v82_v13  ;;  %v247_v20 = vpop.f32.mrf.mxu1  ;;  %v4823_v27 = vadd.f32 %v259_v16, %v84_v17  ;;  %v3448_v13 = vor.u32 %v4485_v8, %v3447_v7  ;;  %v3435_v16 = vld [vmem:[#allocation2 + $0x498] sm:$0xf]  ;;  %v3699_v8 = vld [vmem:[#allocation2 + $0x6a8] sm:$0xf] }
  0xb5   :  { %v4819_v24 = vadd.f32 %v247_v20, %v83_v12  ;;  %v4459_v12 = vld [vmem:[#allocation2 + $0x3e8] sm:$0xf0]  ;;  %v3335_v20 = vld [vmem:[#allocation2 + $0x3c8] sm:$0xf] }
  0xb6   :  { %v267_v26 = vmax.f32 %v4816_v19, 0.0  ;;  %v266_v38 = vmax.f32 %v4823_v27, 0.0  ;;  %v3348_v18 = vor.u32 %v4459_v12, %v3347_v11  ;;  %v3425_v12 = vld [vmem:[#allocation2 + $0x48c] sm:$0xf0] }
  0xb7   :  { %v268_v28 = vmax.f32 %v4819_v24, 0.0 }
  0xb8   :  { %v4830_v30 = vpack.c.bf16 %v267_v26, %v264_v25 }
  0xb9   :  { %v271_v33 = vpack.c.bf16 %v268_v28, %v265_v23 }
  0xba   :  { %771 = vmatmul.bf16.vlgmr.msra.gmra.mxu3 %v4830_v30  ;;  %813 = vmatmul.bf16.vlgmr.msrb.gmra.mxu2 %v4830_v30 }
  0xbb   :  { %v261_v34 = vpop.f32.mrf.mxu2  ;;  %785 = vmatmul.bf16.vlgmr.msrb.gmra.mxu0 %v271_v33  ;;  %875 = vmatpush.bf16.msra.mxu3 %v3420_v29  ;;  %v3509_v29 = vld [vmem:[#allocation2 + $0x534] sm:$0xf0] }
  0xbc   :  { %v4839_v39 = vadd.f32 %v261_v34, %v84_v17  ;;  %1388 = vmatpush.bf16.msrb.mxu0 %v3508_v41  ;;  %v4482_v17 = vld [vmem:[#allocation2 + $0x4a0] sm:$0xf0]  ;;  %v3336_v34 = vor.u32 %v4456_v21, %v3335_v20  ;;  %v3512_v37 = vor.u32 %v4499_v22, %v3509_v29  ;;  %v3497_v41 = vld [vmem:[#allocation2 + $0x51c] sm:$0xf0]  ;;  %v3611_v20 = vld [vmem:[#allocation2 + $0x5f0] sm:$0xf] }
  0xbd   :  { %v3436_v31 = vor.u32 %v4482_v17, %v3435_v16  ;;  %v3569_v16 = vld [vmem:[#allocation2 + $0x5ac] sm:$0xf0]  ;;  %v4525_v21 = vld [vmem:[#allocation2 + $0x5f8] sm:$0xf0]  ;;  %v3555_v22 = vld [vmem:[#allocation2 + $0x588] sm:$0xf] }
  0xbe   :  { %v269_v45 = vmax.f32 %v4839_v39, 0.0  ;;  %v3612_v29 = vor.u32 %v4525_v21, %v3611_v20  ;;  %v3923_v39 = vld [vmem:[#allocation2 + $0x860] sm:$0xf] }
  0xbf   :  { %876 = vmatpush.bf16.msra.mxu3 %v3408_v40  ;;  %v4496_v40 = vld [vmem:[#allocation2 + $0x514] sm:$0xf] }
  0xc0   :  { %v4846_v49 = vpack.c.bf16 %v269_v45, %v266_v38  ;;  %1389 = vmatpush.bf16.msrb.mxu0 %v3496_v46  ;;  %v3500_v44 = vor.u32 %v4496_v40, %v3497_v41  ;;  %v3485_v46 = vld [vmem:[#allocation2 + $0x504] sm:$0xf0]  ;;  %v3599_v40 = vld [vmem:[#allocation2 + $0x5d8] sm:$0xf]  ;;  %v4522_v41 = vld [vmem:[#allocation2 + $0x5e0] sm:$0xf0] }
  0xc2   :  { %799 = vmatmul.bf16.vlgmr.msrb.gmra.mxu1 %v4846_v49 }
  0xc3   :  { %877 = vmatpush.bf16.msra.mxu3 %v3396_v50  ;;  %1402 = vmatpush.bf16.msrb.mxu1 %v3604_v62  ;;  %v3473_v50 = vld [vmem:[#allocation2 + $0x4ec] sm:$0xf0]  ;;  %v4481_v62 = vld [vmem:[#allocation2 + $0x49c] sm:$0xf] }
  0xc4   :  { %1390 = vmatpush.bf16.msrb.mxu0 %v3484_v53  ;;  %v3476_v51 = vor.u32 %v4490_v48, %v3473_v50  ;;  %v3461_v53 = vld [vmem:[#allocation2 + $0x4d4] sm:$0xf0]  ;;  %v3440_v3 = vor.u32 %v4481_v62, %v3437_v0  ;;  %v4542_v48 = vld [vmem:[#allocation2 + $0x680] sm:$0xf0]  ;;  %v4508_v50 = vld [vmem:[#allocation2 + $0x574] sm:$0xf] }
  0xc5   :  { %v3464_v54 = vor.u32 %v4487_v52, %v3461_v53  ;;  %v3545_v52 = vld [vmem:[#allocation2 + $0x57c] sm:$0xf0]  ;;  %v3575_v0 = vld [vmem:[#allocation2 + $0x5a8] sm:$0xf] }
  0xc6   :  { %v3587_v53 = vld [vmem:[#allocation2 + $0x5c0] sm:$0xf] }
  0xc7   :  { %878 = vmatpush.bf16.msra.mxu3 %v3384_v56  ;;  %1403 = vmatpush.bf16.msrb.mxu1 %v3592_v9  ;;  %v3449_v56 = vld [vmem:[#allocation2 + $0x4bc] sm:$0xf0]  ;;  %v4548_v9 = vld [vmem:[#allocation2 + $0x6b0] sm:$0xf0] }
  0xc8   :  { %1391 = vmatpush.bf16.msrb.mxu0 %v3472_v61  ;;  %v3452_v58 = vor.u32 %v4484_v55, %v3449_v56  ;;  %v3579_v61 = vld [vmem:[#allocation2 + $0x5b8] sm:$0xf]  ;;  %v3700_v11 = vor.u32 %v4548_v9, %v3699_v8  ;;  %v3548_v55 = vor.u32 %v4508_v50, %v3545_v52  ;;  %v4538_v52 = vld [vmem:[#allocation2 + $0x664] sm:$0xf] }
  0xc9   :  { %v3701_v8 = vld [vmem:[#allocation2 + $0x6b4] sm:$0xf0] }
  0xca   :  { %827 = vmatmul.bf16.vlgmr.msrb.gmra.mxu3 %v271_v33  ;;  %869 = vmatmul.bf16.vlgmr.msra.gmra.mxu2 %v271_v33  ;;  %v4479_v33 = vld [vmem:[#allocation2 + $0x488] sm:$0xf0] }
  0xcb   :  { %841 = vmatmul.bf16.vlgmr.msra.gmra.mxu0 %v4846_v49  ;;  %879 = vmatpush.bf16.msra.mxu3 %v3372_v1  ;;  %v3424_v42 = vor.u32 %v4479_v33, %v3423_v32  ;;  %v4517_v1 = vld [vmem:[#allocation2 + $0x5bc] sm:$0xf]  ;;  %v3687_v33 = vld [vmem:[#allocation2 + $0x690] sm:$0xf] }
  0xcc   :  { %1392 = vmatpush.bf16.msrb.mxu0 %v3460_v5  ;;  %v3584_v4 = vor.u32 %v4517_v1, %v3581_v2  ;;  %v3567_v5 = vld [vmem:[#allocation2 + $0x5a0] sm:$0xf]  ;;  %1416 = vmatpush.bf16.msrb.mxu2 %v3700_v11  ;;  %v4516_v1 = vld [vmem:[#allocation2 + $0x5b0] sm:$0xf0] }
  0xcd   :  { %v3568_v7 = vor.u32 %v4515_v6, %v3567_v5  ;;  %v4503_v5 = vld [vmem:[#allocation2 + $0x548] sm:$0xf0]  ;;  %v4536_v11 = vld [vmem:[#allocation2 + $0x650] sm:$0xf0] }
  0xcf   :  { %880 = vmatpush.bf16.msra.mxu3 %v3360_v10  ;;  %v4478_v10 = vld [vmem:[#allocation2 + $0x484] sm:$0xf] }
  0xd0   :  { %1393 = vmatpush.bf16.msrb.mxu0 %v3448_v13  ;;  %v4514_v13 = vld [vmem:[#allocation2 + $0x5a4] sm:$0xf]  ;;  %v3428_v17 = vor.u32 %v4478_v10, %v3425_v12  ;;  %v3651_v10 = vld [vmem:[#allocation2 + $0x648] sm:$0xf] }
  0xd1   :  { %v4502_v12 = vld [vmem:[#allocation2 + $0x544] sm:$0xf] }
  0xd2   :  { %855 = vmatmul.bf16.vlgmr.msra.gmra.mxu1 %v4830_v30  ;;  %v4493_v30 = vld [vmem:[#allocation2 + $0x4fc] sm:$0xf] }
  0xd3   :  { %881 = vmatpush.bf16.msra.mxu3 %v3348_v18  ;;  %v3488_v47 = vor.u32 %v4493_v30, %v3485_v46  ;;  %v3572_v18 = vor.u32 %v4514_v13, %v3569_v16  ;;  %v4509_v30 = vld [vmem:[#allocation2 + $0x578] sm:$0xf0]  ;;  %v3652_v13 = vor.u32 %v4536_v11, %v3651_v10  ;;  %v3521_v16 = vld [vmem:[#allocation2 + $0x54c] sm:$0xf0]  ;;  %v3641_v10 = vld [vmem:[#allocation2 + $0x63c] sm:$0xf0] }
  0xd4   :  { %1394 = vmatpush.bf16.msrb.mxu0 %v3436_v31  ;;  %v4512_v31 = vld [vmem:[#allocation2 + $0x590] sm:$0xf0]  ;;  %v3524_v20 = vor.u32 %v4502_v12, %v3521_v16  ;;  %v4495_v16 = vld [vmem:[#allocation2 + $0x508] sm:$0xf0] }
  0xd5   :  { %v3556_v32 = vor.u32 %v4512_v31, %v3555_v22  ;;  %v4544_v22 = vld [vmem:[#allocation2 + $0x694] sm:$0xf] }
  0xd7   :  { %882 = vmatpush.bf16.msra.mxu3 %v3336_v34  ;;  %v4545_v34 = vld [vmem:[#allocation2 + $0x698] sm:$0xf0] }
  0xd8   :  { %1395 = vmatpush.bf16.msrb.mxu0 %v3424_v42  ;;  %v3688_v36 = vor.u32 %v4545_v34, %v3687_v33  ;;  %v4533_v33 = vld [vmem:[#allocation2 + $0x638] sm:$0xf0] }
  0xda   :  { %883 = vmatmul.bf16.vlgmr.msra.gmra.mxu3 %v4846_v49  ;;  %v4518_v49 = vld [vmem:[#allocation2 + $0x5c0] sm:$0xf0]  ;;  %1417 = vmatpush.bf16.msrb.mxu2 %v3688_v36 }
  0xdb   :  { %1430 = vmatpush.bf16.msrb.mxu3 %v3512_v37  ;;  %v3580_v63 = vor.u32 %v4518_v49, %v3579_v61  ;;  %v3557_v37 = vld [vmem:[#allocation2 + $0x594] sm:$0xf0]  ;;  %v4539_v61 = vld [vmem:[#allocation2 + $0x668] sm:$0xf0]  ;;  %v4505_v49 = vld [vmem:[#allocation2 + $0x55c] sm:$0xf] }
  0xdc   :  { %1444 = vmatpush.bf16.msra.mxu0 %v3608_v43  ;;  %v3560_v42 = vor.u32 %v4511_v35, %v3557_v37  ;;  %v3600_v43 = vor.u32 %v4522_v41, %v3599_v40  ;;  %v3551_v35 = vld [vmem:[#allocation2 + $0x578] sm:$0xf]  ;;  %v4510_v36 = vld [vmem:[#allocation2 + $0x580] sm:$0xf0]  ;;  %v4541_v40 = vld [vmem:[#allocation2 + $0x67c] sm:$0xf] }
  0xdd   :  { %1404 = vmatpush.bf16.msrb.mxu1 %v3580_v63  ;;  %v3533_v63 = vld [vmem:[#allocation2 + $0x564] sm:$0xf0]  ;;  %v3552_v37 = vor.u32 %v4510_v36, %v3551_v35 }
  0xde   :  { %v3536_v2 = vor.u32 %v4505_v49, %v3533_v63  ;;  %v3677_v41 = vld [vmem:[#allocation2 + $0x684] sm:$0xf0] }
  0xdf   :  { %1431 = vmatpush.bf16.msrb.mxu3 %v3500_v44  ;;  %v3543_v44 = vld [vmem:[#allocation2 + $0x570] sm:$0xf] }
  0xe0   :  { %1445 = vmatpush.bf16.msra.mxu0 %v3596_v60  ;;  %v3544_v46 = vor.u32 %v4509_v30, %v3543_v44  ;;  %v3663_v60 = vld [vmem:[#allocation2 + $0x660] sm:$0xf]  ;;  %v4530_v44 = vld [vmem:[#allocation2 + $0x620] sm:$0xf0] }
  0xe1   :  { %1405 = vmatpush.bf16.msrb.mxu1 %v3568_v7  ;;  %v3664_v62 = vor.u32 %v4539_v61, %v3663_v60  ;;  %v4547_v7 = vld [vmem:[#allocation2 + $0x6ac] sm:$0xf]  ;;  %v3527_v60 = vld [vmem:[#allocation2 + $0x548] sm:$0xf] }
  0xe2   :  { %v3704_v9 = vor.u32 %v4547_v7, %v3701_v8 }
  0xe3   :  { %1432 = vmatpush.bf16.msrb.mxu3 %v3488_v47  ;;  %v3675_v47 = vld [vmem:[#allocation2 + $0x678] sm:$0xf] }
  0xe4   :  { %1446 = vmatpush.bf16.msra.mxu0 %v3584_v4  ;;  %v3519_v4 = vld [vmem:[#allocation2 + $0x540] sm:$0xf] }
  0xe5   :  { %1406 = vmatpush.bf16.msrb.mxu1 %v3556_v32  ;;  %v3520_v6 = vor.u32 %v4503_v5, %v3519_v4  ;;  %v3639_v32 = vld [vmem:[#allocation2 + $0x630] sm:$0xf]  ;;  %v3503_v5 = vld [vmem:[#allocation2 + $0x518] sm:$0xf] }
  0xe6   :  { %v3640_v34 = vor.u32 %v4533_v33, %v3639_v32  ;;  %v3479_v33 = vld [vmem:[#allocation2 + $0x4e8] sm:$0xf] }
  0xe7   :  { %1433 = vmatpush.bf16.msrb.mxu3 %v3476_v51  ;;  %v3676_v51 = vor.u32 %v4542_v48, %v3675_v47  ;;  %v4507_v47 = vld [vmem:[#allocation2 + $0x568] sm:$0xf0] }
  0xe8   :  { %1447 = vmatpush.bf16.msra.mxu0 %v3572_v18  ;;  %v4513_v18 = vld [vmem:[#allocation2 + $0x598] sm:$0xf0] }
  0xe9   :  { %1407 = vmatpush.bf16.msrb.mxu1 %v3544_v46  ;;  %1418 = vmatpush.bf16.msrb.mxu2 %v3676_v51  ;;  %v3539_v46 = vld [vmem:[#allocation2 + $0x560] sm:$0xf] }
  0xea   :  { %v3540_v48 = vor.u32 %v4507_v47, %v3539_v46  ;;  %v4852_v51 = vld [vmem:[#allocation4 + $0x3] sm:$0x7]  ;;  %v3467_v47 = vld [vmem:[#allocation2 + $0x4d0] sm:$0xf] }
  0xeb   :  { %1434 = vmatpush.bf16.msrb.mxu3 %v3464_v54  ;;  %v4519_v54 = vld [vmem:[#allocation2 + $0x5c8] sm:$0xf0]  ;;  %v373_v61 = vperm.slane %v4852_v51, 0 }
  0xec   :  { %1448 = vmatpush.bf16.msra.mxu0 %v3560_v42  ;;  %v3588_v56 = vor.u32 %v4519_v54, %v3587_v53  ;;  %v3680_v42 = vor.u32 %v4541_v40, %v3677_v41  ;;  %v3665_v53 = vld [vmem:[#allocation2 + $0x66c] sm:$0xf0]  ;;  %v4526_v41 = vld [vmem:[#allocation2 + $0x604] sm:$0xf] }
  0xed   :  { %1419 = vmatpush.bf16.msrb.mxu2 %v3664_v62  ;;  %v3668_v54 = vor.u32 %v4538_v52, %v3665_v53  ;;  %v4504_v62 = vld [vmem:[#allocation2 + $0x550] sm:$0xf0]  ;;  %v374_v52 = vperm.slane %v4852_v51, 1 }
  0xef   :  { %1435 = vmatpush.bf16.msrb.mxu3 %v3452_v58  ;;  %v4506_v58 = vld [vmem:[#allocation2 + $0x560] sm:$0xf0] }
  0xf0   :  { %v3532_v59 = vor.u32 %v4506_v58, %v3531_v57  ;;  %1449 = vmatpush.bf16.msra.mxu0 %v3548_v55  ;;  %v3615_v55 = vld [vmem:[#allocation2 + $0x600] sm:$0xf]  ;;  %v3515_v58 = vld [vmem:[#allocation2 + $0x530] sm:$0xf] }
  0xf1   :  { %1420 = vmatpush.bf16.msrb.mxu2 %v3652_v13  ;;  %v3491_v13 = vld [vmem:[#allocation2 + $0x500] sm:$0xf] }
  0xf2   :  { %1408 = vmatpush.bf16.msrb.mxu1 %v3532_v59  ;;  %v4501_v59 = vld [vmem:[#allocation2 + $0x538] sm:$0xf0] }
  0xf3   :  { %1436 = vmatpush.bf16.msrb.mxu3 %v3440_v3  ;;  %v3576_v3 = vor.u32 %v4516_v1, %v3575_v0  ;;  %v3516_v49 = vor.u32 %v4501_v59, %v3515_v58  ;;  %v3528_v0 = vor.u32 %v4504_v62, %v3527_v60  ;;  %v4535_v1 = vld [vmem:[#allocation2 + $0x64c] sm:$0xf]  ;;  %v3695_v59 = vld [vmem:[#allocation2 + $0x698] sm:$0xf]  ;;  %v4546_v60 = vld [vmem:[#allocation2 + $0x6a0] sm:$0xf0] }
  0xf4   :  { %1450 = vmatpush.bf16.msra.mxu0 %v3536_v2  ;;  %v3653_v2 = vld [vmem:[#allocation2 + $0x654] sm:$0xf0]  ;;  %v4486_v62 = vld [vmem:[#allocation2 + $0x4c0] sm:$0xf0] }
  0xf5   :  { %1421 = vmatpush.bf16.msrb.mxu2 %v3640_v34  ;;  %v4492_v34 = vld [vmem:[#allocation2 + $0x4f0] sm:$0xf0] }
  0xf6   :  { %1409 = vmatpush.bf16.msrb.mxu1 %v3520_v6  ;;  %v4498_v6 = vld [vmem:[#allocation2 + $0x520] sm:$0xf0] }
  0xf7   :  { %1437 = vmatpush.bf16.msrb.mxu3 %v3428_v17  ;;  %v3563_v17 = vld [vmem:[#allocation2 + $0x590] sm:$0xf]  ;;  %v3504_v8 = vor.u32 %v4498_v6, %v3503_v5  ;;  %v3683_v5 = vld [vmem:[#allocation2 + $0x680] sm:$0xf]  ;;  %v4543_v6 = vld [vmem:[#allocation2 + $0x688] sm:$0xf0] }
  0xf8   :  { %v3564_v21 = vor.u32 %v4513_v18, %v3563_v17  ;;  %1451 = vmatpush.bf16.msra.mxu0 %v3524_v20  ;;  %v3492_v18 = vor.u32 %v4495_v16, %v3491_v13  ;;  %v3684_v13 = vor.u32 %v4543_v6, %v3683_v5 }
  0xfa   :  { %1458 = vmatpush.bf16.msra.mxu1 %v3704_v9  ;;  %v4532_v9 = vld [vmem:[#allocation2 + $0x634] sm:$0xf] }
  0xfb   :  { %1486 = vmatpush.bf16.msra.mxu3 %v3612_v29  ;;  %v3689_v29 = vld [vmem:[#allocation2 + $0x69c] sm:$0xf0]  ;;  %v3644_v11 = vor.u32 %v4532_v9, %v3641_v10  ;;  %v3431_v9 = vld [vmem:[#allocation2 + $0x488] sm:$0xf]  ;;  %v4480_v10 = vld [vmem:[#allocation2 + $0x490] sm:$0xf0] }
  0xfc   :  { %v3692_v31 = vor.u32 %v4544_v22, %v3689_v29  ;;  %v4529_v22 = vld [vmem:[#allocation2 + $0x61c] sm:$0xf]  ;;  %v3629_v29 = vld [vmem:[#allocation2 + $0x624] sm:$0xf0] }
  0xfd   :  { %v3632_v32 = vor.u32 %v4529_v22, %v3629_v29 }
  0xfe   :  { %1459 = vmatpush.bf16.msra.mxu1 %v3692_v31 }
  0xff   :  { %1487 = vmatpush.bf16.msra.mxu3 %v3600_v43  ;;  %v3627_v43 = vld [vmem:[#allocation2 + $0x618] sm:$0xf] }
 0x100   :  { %v3628_v30 = vor.u32 %v4530_v44, %v3627_v43  ;;  %v3707_v44 = vld [vmem:[#allocation2 + $0x6b0] sm:$0xf] }
 0x102   :  { %1460 = vmatpush.bf16.msra.mxu1 %v3680_v42  ;;  %1422 = vmatpush.bf16.msrb.mxu2 %v3628_v30  ;;  %v3617_v42 = vld [vmem:[#allocation2 + $0x60c] sm:$0xf0]  ;;  %v4549_v30 = vld [vmem:[#allocation2 + $0x6b8] sm:$0xf0] }
 0x103   :  { %1488 = vmatpush.bf16.msra.mxu3 %v3588_v56  ;;  %v4527_v56 = vld [vmem:[#allocation2 + $0x608] sm:$0xf0]  ;;  %v3620_v46 = vor.u32 %v4526_v41, %v3617_v42  ;;  %v3795_v41 = vld [vmem:[#allocation2 + $0x768] sm:$0xf]  ;;  %v4572_v42 = vld [vmem:[#allocation2 + $0x770] sm:$0xf0] }
 0x104   :  { %v3616_v57 = vor.u32 %v4527_v56, %v3615_v55 }
 0x106   :  { %1461 = vmatpush.bf16.msra.mxu1 %v3668_v54  ;;  %1423 = vmatpush.bf16.msrb.mxu2 %v3616_v57  ;;  %v3708_v57 = vor.u32 %v4549_v30, %v3707_v44 }
 0x107   :  { %1489 = vmatpush.bf16.msra.mxu3 %v3576_v3  ;;  %v3656_v3 = vor.u32 %v4535_v1, %v3653_v2  ;;  %v3443_v1 = vld [vmem:[#allocation2 + $0x4a0] sm:$0xf]  ;;  %v4483_v2 = vld [vmem:[#allocation2 + $0x4a8] sm:$0xf0] }
 0x10a   :  { %1472 = vmatpush.bf16.msra.mxu2 %v3516_v49  ;;  %1462 = vmatpush.bf16.msra.mxu1 %v3656_v3  ;;  %v3455_v49 = vld [vmem:[#allocation2 + $0x4b8] sm:$0xf]  ;;  %v3696_v3 = vor.u32 %v4546_v60, %v3695_v59  ;;  %v4531_v59 = vld [vmem:[#allocation2 + $0x628] sm:$0xf0] }
 0x10b   :  { %1490 = vmatpush.bf16.msra.mxu3 %v3564_v21 }
 0x10e   :  { %1473 = vmatpush.bf16.msra.mxu2 %v3504_v8  ;;  %1463 = vmatpush.bf16.msra.mxu1 %v3644_v11 }
 0x10f   :  { %1491 = vmatpush.bf16.msra.mxu3 %v3552_v37  ;;  %v3480_v37 = vor.u32 %v4492_v34, %v3479_v33 }
 0x112   :  { %1474 = vmatpush.bf16.msra.mxu2 %v3492_v18  ;;  %1464 = vmatpush.bf16.msra.mxu1 %v3632_v32  ;;  %v3671_v18 = vld [vmem:[#allocation2 + $0x668] sm:$0xf] }
 0x113   :  { %1492 = vmatpush.bf16.msra.mxu3 %v3540_v48  ;;  %v4489_v48 = vld [vmem:[#allocation2 + $0x4d8] sm:$0xf0] }
 0x114   :  { %v3468_v54 = vor.u32 %v4489_v48, %v3467_v47  ;;  %v3796_v47 = vor.u32 %v4572_v42, %v3795_v41  ;;  %v4569_v48 = vld [vmem:[#allocation2 + $0x758] sm:$0xf0] }
 0x115   :  { %v4565_v41 = vld [vmem:[#allocation2 + $0x73c] sm:$0xf] }
 0x116   :  { %1475 = vmatpush.bf16.msra.mxu2 %v3480_v37  ;;  %1465 = vmatpush.bf16.msra.mxu1 %v3620_v46  ;;  %v4537_v37 = vld [vmem:[#allocation2 + $0x658] sm:$0xf0] }
 0x117   :  { %1493 = vmatpush.bf16.msra.mxu3 %v3528_v0  ;;  %v3456_v0 = vor.u32 %v4486_v62, %v3455_v49 }
 0x11a   :  { %1476 = vmatpush.bf16.msra.mxu2 %v3468_v54 }
 0x11e   :  { %1477 = vmatpush.bf16.msra.mxu2 %v3456_v0 }
 0x138   :  { %v786_v50 = vpop.f32.mrf.mxu0 }
 0x13d   :  { %v772_v63 = vpop.f32.mrf.mxu3  ;;  %v814_v20 = vpop.f32.mrf.mxu2 }
 0x13e   :  { %v773_v7 = vadd.f32 %v772_v63, %v373_v61  ;;  %v815_v63 = vadd.f32 %v814_v20, %v374_v52  ;;  %v4540_v20 = vld [vmem:[#allocation2 + $0x670] sm:$0xf0] }
 0x13f   :  { %v800_v4 = vpop.f32.mrf.mxu1  ;;  %v3672_v33 = vor.u32 %v4540_v20, %v3671_v18  ;;  %v3747_v18 = vld [vmem:[#allocation2 + $0x708] sm:$0xf]  ;;  %v4560_v20 = vld [vmem:[#allocation2 + $0x710] sm:$0xf0] }
 0x140   :  { %v788_v12 = vpop.f32.mrf.mxu0  ;;  %v787_v17 = vadd.f32 %v786_v50, %v773_v7  ;;  %v3444_v7 = vor.u32 %v4483_v2, %v3443_v1  ;;  %v3623_v1 = vld [vmem:[#allocation2 + $0x608] sm:$0xf]  ;;  %v4528_v2 = vld [vmem:[#allocation2 + $0x610] sm:$0xf0] }
 0x141   :  { %v3624_v5 = vor.u32 %v4528_v2, %v3623_v1 }
 0x142   :  { %v801_v35 = vadd.f32 %v800_v4, %v787_v17  ;;  %1478 = vmatpush.bf16.msra.mxu2 %v3444_v7  ;;  %v3771_v7 = vld [vmem:[#allocation2 + $0x738] sm:$0xf] }
 0x144   :  { %v889_v50 = vmax.f32 %v801_v35, 0.0 }
 0x145   :  { %v774_v21 = vpop.f32.mrf.mxu3 }
 0x146   :  { %v775_v31 = vadd.f32 %v774_v21, %v373_v61  ;;  %v816_v61 = vpop.f32.mrf.mxu2  ;;  %v3432_v21 = vor.u32 %v4480_v10, %v3431_v9  ;;  %v3759_v10 = vld [vmem:[#allocation2 + $0x720] sm:$0xf] }
 0x147   :  { %v802_v40 = vpop.f32.mrf.mxu1  ;;  %v817_v11 = vadd.f32 %v816_v61, %v374_v52  ;;  %v4534_v52 = vld [vmem:[#allocation2 + $0x640] sm:$0xf0] }
 0x148   :  { %v789_v36 = vadd.f32 %v788_v12, %v775_v31  ;;  %v842_v55 = vpop.f32.mrf.mxu0  ;;  %v375_v31 = vperm.slane %v4852_v51, 2  ;;  %1479 = vmatpush.bf16.msra.mxu2 %v3432_v21  ;;  %v3647_v51 = vld [vmem:[#allocation2 + $0x638] sm:$0xf]  ;;  %v3748_v21 = vor.u32 %v4560_v20, %v3747_v18  ;;  %v4581_v18 = vld [vmem:[#allocation2 + $0x7b8] sm:$0xf0] }
 0x149   :  { %v3975_v20 = vld [vmem:[#allocation2 + $0x8d0] sm:$0xf] }
 0x14a   :  { %v803_v43 = vadd.f32 %v802_v40, %v789_v36  ;;  %v3659_v36 = vld [vmem:[#allocation2 + $0x650] sm:$0xf] }
 0x14b   :  { %v3660_v46 = vor.u32 %v4537_v37, %v3659_v36  ;;  %v3879_v37 = vld [vmem:[#allocation2 + $0x810] sm:$0xf] }
 0x14c   :  { %v892_v53 = vmax.f32 %v803_v43, 0.0  ;;  %v3783_v43 = vld [vmem:[#allocation2 + $0x750] sm:$0xf] }
 0x14d   :  { %v828_v56 = vpop.f32.mrf.mxu3 }
 0x14e   :  { %v4856_v58 = vpack.c.bf16 %v892_v53, %v889_v50  ;;  %v829_v4 = vadd.f32 %v828_v56, %v815_v63  ;;  %v870_v32 = vpop.f32.mrf.mxu2  ;;  %v3784_v53 = vor.u32 %v4569_v48, %v3783_v43  ;;  %v3773_v43 = vld [vmem:[#allocation2 + $0x744] sm:$0xf0]  ;;  %v3867_v48 = vld [vmem:[#allocation2 + $0x7f8] sm:$0xf] }
 0x14f   :  { %v856_v8 = vpop.f32.mrf.mxu1 }
 0x150   :  { %1396 = vmatmul.bf16.vlgmr.msrb.gmra.mxu0 %v4856_v58  ;;  %1438 = vmatmul.bf16.vlgmr.msrb.gmra.mxu3 %v4856_v58  ;;  %v843_v16 = vadd.f32 %v842_v55, %v829_v4  ;;  %v844_v22 = vpop.f32.mrf.mxu0  ;;  %v857_v50 = vadd.f32 %v856_v8, %v375_v31  ;;  %v3648_v55 = vor.u32 %v4534_v52, %v3647_v51  ;;  %v4566_v8 = vld [vmem:[#allocation2 + $0x740] sm:$0xf0] }
 0x151   :  { %1500 = vmatpush.bf16.msrb.mxu0 %v3708_v57  ;;  %v3635_v57 = vld [vmem:[#allocation2 + $0x620] sm:$0xf]  ;;  %v3772_v9 = vor.u32 %v4566_v8, %v3771_v7  ;;  %v4562_v51 = vld [vmem:[#allocation2 + $0x724] sm:$0xf]  ;;  %v4620_v7 = vld [vmem:[#allocation2 + $0x8f0] sm:$0xf0] }
 0x152   :  { %v890_v34 = vmax.f32 %v843_v16, 0.0  ;;  %v871_v56 = vadd.f32 %v870_v32, %v857_v50  ;;  %v3636_v63 = vor.u32 %v4531_v59, %v3635_v57  ;;  %v3797_v16 = vld [vmem:[#allocation2 + $0x774] sm:$0xf0]  ;;  %v4590_v50 = vld [vmem:[#allocation2 + $0x800] sm:$0xf0] }
 0x153   :  { %v3868_v52 = vor.u32 %v4590_v50, %v3867_v48  ;;  %v3855_v59 = vld [vmem:[#allocation2 + $0x7e0] sm:$0xf]  ;;  %v4556_v8 = vld [vmem:[#allocation2 + $0x6f4] sm:$0xf]  ;;  %v3857_v48 = vld [vmem:[#allocation2 + $0x7ec] sm:$0xf0] }
 0x154   :  { %v3899_v50 = vld [vmem:[#allocation2 + $0x830] sm:$0xf] }
 0x155   :  { %v830_v12 = vpop.f32.mrf.mxu3  ;;  %1501 = vmatpush.bf16.msrb.mxu0 %v3696_v3 }
 0x156   :  { %v831_v17 = vadd.f32 %v830_v12, %v817_v11  ;;  %v872_v60 = vpop.f32.mrf.mxu2  ;;  %v4563_v11 = vld [vmem:[#allocation2 + $0x728] sm:$0xf0] }
 0x157   :  { %v858_v44 = vpop.f32.mrf.mxu1  ;;  %v3760_v12 = vor.u32 %v4563_v11, %v3759_v10 }
 0x158   :  { %v845_v29 = vadd.f32 %v844_v22, %v831_v17  ;;  %v859_v54 = vadd.f32 %v858_v44, %v375_v31  ;;  %v3891_v22 = vld [vmem:[#allocation2 + $0x828] sm:$0xf]  ;;  %v4568_v31 = vld [vmem:[#allocation2 + $0x754] sm:$0xf]  ;;  %v3776_v44 = vor.u32 %v4565_v41, %v3773_v43  ;;  %v4550_v43 = vld [vmem:[#allocation2 + $0x6c4] sm:$0xf] }
 0x159   :  { %1502 = vmatpush.bf16.msrb.mxu0 %v3684_v13  ;;  %v4571_v13 = vld [vmem:[#allocation2 + $0x76c] sm:$0xf] }
 0x15a   :  { %v893_v35 = vmax.f32 %v845_v29, 0.0  ;;  %v873_v61 = vadd.f32 %v872_v60, %v859_v54  ;;  %v3800_v17 = vor.u32 %v4571_v13, %v3797_v16  ;;  %v4596_v29 = vld [vmem:[#allocation2 + $0x830] sm:$0xf0]  ;;  %v4587_v60 = vld [vmem:[#allocation2 + $0x7e8] sm:$0xf0] }
 0x15b   :  { %v3892_v32 = vor.u32 %v4596_v29, %v3891_v22  ;;  %v3881_v13 = vld [vmem:[#allocation2 + $0x81c] sm:$0xf0]  ;;  %v4617_v22 = vld [vmem:[#allocation2 + $0x8d8] sm:$0xf0] }
 0x15c   :  { %v896_v40 = vpack.c.bf16 %v893_v35, %v890_v34  ;;  %v3735_v34 = vld [vmem:[#allocation2 + $0x6f0] sm:$0xf]  ;;  %v4557_v35 = vld [vmem:[#allocation2 + $0x6f8] sm:$0xf0] }
 0x15d   :  { %v884_v30 = vpop.f32.mrf.mxu3  ;;  %1503 = vmatpush.bf16.msrb.mxu0 %v3672_v33  ;;  %v3736_v36 = vor.u32 %v4557_v35, %v3735_v34  ;;  %v4553_v29 = vld [vmem:[#allocation2 + $0x6dc] sm:$0xf]  ;;  %v3869_v34 = vld [vmem:[#allocation2 + $0x804] sm:$0xf0] }
 0x15e   :  { %1410 = vmatmul.bf16.vlgmr.msrb.gmra.mxu1 %v896_v40  ;;  %v885_v49 = vadd.f32 %v884_v30, %v871_v56  ;;  %v3723_v30 = vld [vmem:[#allocation2 + $0x6d8] sm:$0xf]  ;;  %v4551_v56 = vld [vmem:[#allocation2 + $0x6c8] sm:$0xf0] }
 0x15f   :  { %2019 = vmatpush.bf16.msrb.mxu1 %v3796_v47 }
 0x160   :  { %1452 = vmatmul.bf16.vlgmr.msra.gmra.mxu0 %v896_v40  ;;  %1494 = vmatmul.bf16.vlgmr.msra.gmra.mxu3 %v896_v40  ;;  %v891_v3 = vmax.f32 %v885_v49, 0.0  ;;  %v4593_v40 = vld [vmem:[#allocation2 + $0x818] sm:$0xf0]  ;;  %v3856_v49 = vor.u32 %v4587_v60, %v3855_v59  ;;  %v4611_v60 = vld [vmem:[#allocation2 + $0x8a8] sm:$0xf0] }
 0x161   :  { %1504 = vmatpush.bf16.msrb.mxu0 %v3660_v46  ;;  %v3880_v42 = vor.u32 %v4593_v40, %v3879_v37  ;;  %v4554_v46 = vld [vmem:[#allocation2 + $0x6e0] sm:$0xf0]  ;;  %v3963_v40 = vld [vmem:[#allocation2 + $0x8b8] sm:$0xf] }
 0x162   :  { %v3724_v47 = vor.u32 %v4554_v46, %v3723_v30  ;;  %v4578_v37 = vld [vmem:[#allocation2 + $0x7a0] sm:$0xf0] }
 0x163   :  { %2020 = vmatpush.bf16.msrb.mxu1 %v3784_v53  ;;  %v3761_v53 = vld [vmem:[#allocation2 + $0x72c] sm:$0xf0] }
 0x164   :  { %v3764_v54 = vor.u32 %v4562_v51, %v3761_v53  ;;  %v4597_v53 = vld [vmem:[#allocation2 + $0x838] sm:$0xf0] }
 0x165   :  { %v886_v62 = vpop.f32.mrf.mxu3  ;;  %1505 = vmatpush.bf16.msrb.mxu0 %v3648_v55  ;;  %v3711_v55 = vld [vmem:[#allocation2 + $0x6c0] sm:$0xf] }
 0x166   :  { %v887_v0 = vadd.f32 %v886_v62, %v873_v61  ;;  %v3712_v57 = vor.u32 %v4551_v56, %v3711_v55  ;;  %v4559_v61 = vld [vmem:[#allocation2 + $0x70c] sm:$0xf]  ;;  %v3749_v62 = vld [vmem:[#allocation2 + $0x714] sm:$0xf0]  ;;  %v3807_v55 = vld [vmem:[#allocation2 + $0x780] sm:$0xf] }
 0x167   :  { %2021 = vmatpush.bf16.msrb.mxu1 %v3772_v9  ;;  %v3752_v1 = vor.u32 %v4559_v61, %v3749_v62  ;;  %v3737_v9 = vld [vmem:[#allocation2 + $0x6fc] sm:$0xf0]  ;;  %v4575_v56 = vld [vmem:[#allocation2 + $0x788] sm:$0xf0] }
 0x168   :  { %v894_v4 = vmax.f32 %v887_v0, 0.0  ;;  %v3893_v0 = vld [vmem:[#allocation2 + $0x834] sm:$0xf0]  ;;  %v3740_v11 = vor.u32 %v4556_v8, %v3737_v9  ;;  %v3808_v59 = vor.u32 %v4575_v56, %v3807_v55  ;;  %v4583_v61 = vld [vmem:[#allocation2 + $0x7cc] sm:$0xf] }
 0x169   :  { %1506 = vmatpush.bf16.msrb.mxu0 %v3636_v63  ;;  %v4595_v63 = vld [vmem:[#allocation2 + $0x82c] sm:$0xf]  ;;  %v4580_v8 = vld [vmem:[#allocation2 + $0x7b4] sm:$0xf] }
 0x16a   :  { %v897_v6 = vpack.c.bf16 %v894_v4, %v891_v3  ;;  %v3896_v2 = vor.u32 %v4595_v63, %v3893_v0  ;;  %v3843_v3 = vld [vmem:[#allocation2 + $0x7c8] sm:$0xf]  ;;  %v4584_v4 = vld [vmem:[#allocation2 + $0x7d0] sm:$0xf0]  ;;  %v4619_v0 = vld [vmem:[#allocation2 + $0x8ec] sm:$0xf] }
 0x16b   :  { %2022 = vmatpush.bf16.msrb.mxu1 %v3760_v12  ;;  %v4592_v12 = vld [vmem:[#allocation2 + $0x814] sm:$0xf] }
 0x16c   :  { %1424 = vmatmul.bf16.vlgmr.msrb.gmra.mxu2 %v897_v6  ;;  %v3884_v16 = vor.u32 %v4592_v12, %v3881_v13  ;;  %v3977_v12 = vld [vmem:[#allocation2 + $0x8dc] sm:$0xf0] }
 0x16d   :  { %1507 = vmatpush.bf16.msrb.mxu0 %v3624_v5  ;;  %2033 = vmatpush.bf16.msrb.mxu2 %v3892_v32  ;;  %v3987_v5 = vld [vmem:[#allocation2 + $0x8e8] sm:$0xf]  ;;  %v3976_v32 = vor.u32 %v4617_v22, %v3975_v20  ;;  %v4605_v22 = vld [vmem:[#allocation2 + $0x878] sm:$0xf0] }
 0x16e   :  { %1466 = vmatmul.bf16.vlgmr.msra.gmra.mxu1 %v897_v6  ;;  %v3988_v10 = vor.u32 %v4620_v7, %v3987_v5  ;;  %v4608_v7 = vld [vmem:[#allocation2 + $0x890] sm:$0xf0] }
 0x16f   :  { %2023 = vmatpush.bf16.msrb.mxu1 %v3748_v21 }
 0x170   :  { %1508 = vmatmul.bf16.vlgmr.msrb.gmra.mxu0 %v897_v6  ;;  %v3844_v6 = vor.u32 %v4584_v4, %v3843_v3  ;;  %2047 = vmatpush.bf16.msrb.mxu3 %v3988_v10  ;;  %v4594_v4 = vld [vmem:[#allocation2 + $0x820] sm:$0xf0]  ;;  %v3833_v10 = vld [vmem:[#allocation2 + $0x7bc] sm:$0xf0] }
 0x171   :  { %2061 = vmatpush.bf16.msra.mxu0 %v3800_v17  ;;  %2034 = vmatpush.bf16.msrb.mxu2 %v3880_v42  ;;  %v3831_v17 = vld [vmem:[#allocation2 + $0x7b0] sm:$0xf]  ;;  %v4614_v42 = vld [vmem:[#allocation2 + $0x8c0] sm:$0xf0]  ;;  %v3836_v13 = vor.u32 %v4580_v8, %v3833_v10  ;;  %v4604_v10 = vld [vmem:[#allocation2 + $0x874] sm:$0xf] }
 0x172   :  { %v3832_v21 = vor.u32 %v4581_v18, %v3831_v17  ;;  %v3964_v30 = vor.u32 %v4614_v42, %v3963_v40  ;;  %v3875_v17 = vld [vmem:[#allocation2 + $0x800] sm:$0xf]  ;;  %v4591_v18 = vld [vmem:[#allocation2 + $0x808] sm:$0xf0]  ;;  %v3863_v40 = vld [vmem:[#allocation2 + $0x7e8] sm:$0xf] }
 0x173   :  { %2024 = vmatpush.bf16.msrb.mxu1 %v3736_v36  ;;  %v3819_v36 = vld [vmem:[#allocation2 + $0x798] sm:$0xf]  ;;  %v3876_v20 = vor.u32 %v4591_v18, %v3875_v17  ;;  %v3827_v17 = vld [vmem:[#allocation2 + $0x7a0] sm:$0xf]  ;;  %v4579_v18 = vld [vmem:[#allocation2 + $0x7a8] sm:$0xf0] }
 0x174   :  { %2048 = vmatpush.bf16.msrb.mxu3 %v3976_v32  ;;  %v3820_v41 = vor.u32 %v4578_v37, %v3819_v36 }
 0x175   :  { %2035 = vmatpush.bf16.msrb.mxu2 %v3868_v52 }
 0x177   :  { %2025 = vmatpush.bf16.msrb.mxu1 %v3724_v47  ;;  %v4586_v47 = vld [vmem:[#allocation2 + $0x7e4] sm:$0xf] }
 0x178   :  { %v3860_v52 = vor.u32 %v4586_v47, %v3857_v48  ;;  %2049 = vmatpush.bf16.msrb.mxu3 %v3964_v30  ;;  %v3809_v47 = vld [vmem:[#allocation2 + $0x78c] sm:$0xf0]  ;;  %v4610_v48 = vld [vmem:[#allocation2 + $0x8a4] sm:$0xf] }
 0x179   :  { %2036 = vmatpush.bf16.msrb.mxu2 %v3856_v49  ;;  %v3845_v49 = vld [vmem:[#allocation2 + $0x7d4] sm:$0xf0] }
 0x17a   :  { %v3848_v63 = vor.u32 %v4583_v61, %v3845_v49 }
 0x17b   :  { %2026 = vmatpush.bf16.msrb.mxu1 %v3712_v57  ;;  %v3951_v57 = vld [vmem:[#allocation2 + $0x8a0] sm:$0xf] }
 0x17c   :  { %1480 = vmatmul.bf16.vlgmr.msra.gmra.mxu2 %v4856_v58  ;;  %v3785_v58 = vld [vmem:[#allocation2 + $0x75c] sm:$0xf0]  ;;  %v3952_v62 = vor.u32 %v4611_v60, %v3951_v57 }
 0x17d   :  { %v3788_v33 = vor.u32 %v4568_v31, %v3785_v58  ;;  %2037 = vmatpush.bf16.msrb.mxu2 %v3844_v6  ;;  %v3725_v31 = vld [vmem:[#allocation2 + $0x6e4] sm:$0xf0]  ;;  %v3903_v57 = vld [vmem:[#allocation2 + $0x840] sm:$0xf] }
 0x17e   :  { %v3728_v58 = vor.u32 %v4553_v29, %v3725_v31  ;;  %2050 = vmatpush.bf16.msrb.mxu3 %v3952_v62  ;;  %v3939_v6 = vld [vmem:[#allocation2 + $0x888] sm:$0xf]  ;;  %v4577_v29 = vld [vmem:[#allocation2 + $0x79c] sm:$0xf]  ;;  %v4607_v62 = vld [vmem:[#allocation2 + $0x88c] sm:$0xf] }
 0x17f   :  { %2062 = vmatpush.bf16.msra.mxu0 %v3788_v33  ;;  %2075 = vmatpush.bf16.msra.mxu1 %v3896_v2  ;;  %v4589_v33 = vld [vmem:[#allocation2 + $0x7fc] sm:$0xf]  ;;  %v3887_v2 = vld [vmem:[#allocation2 + $0x818] sm:$0xf]  ;;  %v3940_v9 = vor.u32 %v4608_v7, %v3939_v6 }
 0x180   :  { %v3872_v35 = vor.u32 %v4589_v33, %v3869_v34  ;;  %v3888_v5 = vor.u32 %v4594_v4, %v3887_v2  ;;  %v3821_v33 = vld [vmem:[#allocation2 + $0x7a4] sm:$0xf0]  ;;  %v4613_v34 = vld [vmem:[#allocation2 + $0x8bc] sm:$0xf]  ;;  %v4582_v4 = vld [vmem:[#allocation2 + $0x7c0] sm:$0xf0] }
 0x181   :  { %2038 = vmatpush.bf16.msrb.mxu2 %v3832_v21  ;;  %v3927_v21 = vld [vmem:[#allocation2 + $0x870] sm:$0xf]  ;;  %v3824_v36 = vor.u32 %v4577_v29, %v3821_v33  ;;  %v4573_v2 = vld [vmem:[#allocation2 + $0x778] sm:$0xf0]  ;;  %v3917_v33 = vld [vmem:[#allocation2 + $0x864] sm:$0xf0] }
 0x182   :  { %2051 = vmatpush.bf16.msrb.mxu3 %v3940_v9 }
 0x183   :  { %2063 = vmatpush.bf16.msra.mxu0 %v3776_v44  ;;  %2076 = vmatpush.bf16.msra.mxu1 %v3884_v16  ;;  %v3713_v44 = vld [vmem:[#allocation2 + $0x6cc] sm:$0xf0] }
 0x184   :  { %v3716_v46 = vor.u32 %v4550_v43, %v3713_v44  ;;  %v3915_v43 = vld [vmem:[#allocation2 + $0x858] sm:$0xf]  ;;  %v4602_v44 = vld [vmem:[#allocation2 + $0x860] sm:$0xf0] }
 0x185   :  { %2039 = vmatpush.bf16.msrb.mxu2 %v3820_v41  ;;  %v4588_v41 = vld [vmem:[#allocation2 + $0x7f0] sm:$0xf0]  ;;  %v3916_v30 = vor.u32 %v4602_v44, %v3915_v43 }
 0x186   :  { %v3864_v42 = vor.u32 %v4588_v41, %v3863_v40  ;;  %v3815_v40 = vld [vmem:[#allocation2 + $0x788] sm:$0xf]  ;;  %v4576_v41 = vld [vmem:[#allocation2 + $0x790] sm:$0xf0] }
 0x187   :  { %2064 = vmatpush.bf16.msra.mxu0 %v3764_v54  ;;  %2077 = vmatpush.bf16.msra.mxu1 %v3872_v35  ;;  %v3900_v54 = vor.u32 %v4597_v53, %v3899_v50  ;;  %v3965_v35 = vld [vmem:[#allocation2 + $0x8c4] sm:$0xf0]  ;;  %v3851_v53 = vld [vmem:[#allocation2 + $0x7d0] sm:$0xf]  ;;  %v3816_v44 = vor.u32 %v4576_v41, %v3815_v40  ;;  %v4615_v40 = vld [vmem:[#allocation2 + $0x8c8] sm:$0xf0] }
 0x188   :  { %v3968_v37 = vor.u32 %v4613_v34, %v3965_v35  ;;  %v3779_v34 = vld [vmem:[#allocation2 + $0x740] sm:$0xf] }
 0x189   :  { %2040 = vmatpush.bf16.msrb.mxu2 %v3808_v59  ;;  %v4599_v59 = vld [vmem:[#allocation2 + $0x848] sm:$0xf0] }
 0x18a   :  { %v3904_v49 = vor.u32 %v4599_v59, %v3903_v57  ;;  %v4564_v57 = vld [vmem:[#allocation2 + $0x730] sm:$0xf0] }
 0x18b   :  { %2065 = vmatpush.bf16.msra.mxu0 %v3752_v1  ;;  %2078 = vmatpush.bf16.msra.mxu1 %v3860_v52  ;;  %v3989_v1 = vld [vmem:[#allocation2 + $0x8f4] sm:$0xf0]  ;;  %v3953_v52 = vld [vmem:[#allocation2 + $0x8ac] sm:$0xf0] }
 0x18c   :  { %v3992_v3 = vor.u32 %v4619_v0, %v3989_v1  ;;  %v3956_v55 = vor.u32 %v4610_v48, %v3953_v52  ;;  %v3803_v0 = vld [vmem:[#allocation2 + $0x770] sm:$0xf]  ;;  %v4598_v48 = vld [vmem:[#allocation2 + $0x844] sm:$0xf]  ;;  %v3767_v52 = vld [vmem:[#allocation2 + $0x728] sm:$0xf] }
 0x18d   :  { %v3804_v7 = vor.u32 %v4573_v2, %v3803_v0  ;;  %v3768_v59 = vor.u32 %v4564_v57, %v3767_v52  ;;  %v3755_v0 = vld [vmem:[#allocation2 + $0x710] sm:$0xf]  ;;  %v4638_v57 = vld [vmem:[#allocation2 + $0x980] sm:$0xf0] }
 0x18e   :  { %2089 = vmatpush.bf16.msra.mxu2 %v3992_v3  ;;  %v3839_v3 = vld [vmem:[#allocation2 + $0x7b8] sm:$0xf] }
 0x18f   :  { %2066 = vmatpush.bf16.msra.mxu0 %v3740_v11  ;;  %2079 = vmatpush.bf16.msra.mxu1 %v3848_v63  ;;  %v4616_v11 = vld [vmem:[#allocation2 + $0x8d4] sm:$0xf]  ;;  %v3941_v63 = vld [vmem:[#allocation2 + $0x894] sm:$0xf0]  ;;  %v3840_v8 = vor.u32 %v4582_v4, %v3839_v3 }
 0x190   :  { %v3980_v16 = vor.u32 %v4616_v11, %v3977_v12  ;;  %v3944_v1 = vor.u32 %v4607_v62, %v3941_v63  ;;  %v3929_v11 = vld [vmem:[#allocation2 + $0x87c] sm:$0xf0]  ;;  %v3791_v12 = vld [vmem:[#allocation2 + $0x758] sm:$0xf] }
 0x192   :  { %2090 = vmatpush.bf16.msra.mxu2 %v3980_v16  ;;  %v4570_v16 = vld [vmem:[#allocation2 + $0x760] sm:$0xf0] }
 0x193   :  { %2067 = vmatpush.bf16.msra.mxu0 %v3728_v58  ;;  %2080 = vmatpush.bf16.msra.mxu1 %v3836_v13  ;;  %v3928_v58 = vor.u32 %v4605_v22, %v3927_v21  ;;  %v3932_v13 = vor.u32 %v4604_v10, %v3929_v11  ;;  %v3828_v21 = vor.u32 %v4579_v18, %v3827_v17 }
 0x195   :  { %2052 = vmatpush.bf16.msrb.mxu3 %v3928_v58  ;;  %v4601_v58 = vld [vmem:[#allocation2 + $0x85c] sm:$0xf] }
 0x196   :  { %2091 = vmatpush.bf16.msra.mxu2 %v3968_v37  ;;  %v4567_v37 = vld [vmem:[#allocation2 + $0x748] sm:$0xf0] }
 0x197   :  { %2068 = vmatpush.bf16.msra.mxu0 %v3716_v46  ;;  %2081 = vmatpush.bf16.msra.mxu1 %v3824_v36  ;;  %v4574_v46 = vld [vmem:[#allocation2 + $0x784] sm:$0xf]  ;;  %v3920_v36 = vor.u32 %v4601_v58, %v3917_v33  ;;  %v3780_v43 = vor.u32 %v4567_v37, %v3779_v34  ;;  %v3719_v58 = vld [vmem:[#allocation2 + $0x6c8] sm:$0xf]  ;;  %v4552_v33 = vld [vmem:[#allocation2 + $0x6d0] sm:$0xf0] }
 0x198   :  { %v3812_v50 = vor.u32 %v4574_v46, %v3809_v47  ;;  %v3971_v37 = vld [vmem:[#allocation2 + $0x8c0] sm:$0xf] }
 0x199   :  { %2053 = vmatpush.bf16.msrb.mxu3 %v3916_v30 }
 0x19a   :  { %2092 = vmatpush.bf16.msra.mxu2 %v3956_v55 }
 0x19b   :  { %2117 = vmatpush.bf16.msrb.mxu0 %v3900_v54  ;;  %v4585_v54 = vld [vmem:[#allocation2 + $0x7d8] sm:$0xf0]  ;;  %2082 = vmatpush.bf16.msra.mxu1 %v3812_v50  ;;  %v3905_v50 = vld [vmem:[#allocation2 + $0x84c] sm:$0xf0] }
 0x19c   :  { %v3852_v56 = vor.u32 %v4585_v54, %v3851_v53 }
 0x19d   :  { %2054 = vmatpush.bf16.msrb.mxu3 %v3904_v49 }
 0x19e   :  { %2093 = vmatpush.bf16.msra.mxu2 %v3944_v1  ;;  %v4561_v1 = vld [vmem:[#allocation2 + $0x718] sm:$0xf0] }
 0x19f   :  { %2118 = vmatpush.bf16.msrb.mxu0 %v3888_v5  ;;  %v4870_v5 = vld [vmem:[#allocation4 + $0x6] sm:$0x7]  ;;  %v3756_v4 = vor.u32 %v4561_v1, %v3755_v0 }
 0x1a0   :  { %v999_v9 = vperm.slane %v4870_v5, 1  ;;  %v998_v22 = vperm.slane %v4870_v5, 0  ;;  %v1000_v18 = vperm.slane %v4870_v5, 2  ;;  %v3720_v5 = vor.u32 %v4552_v33, %v3719_v58  ;;  %v4179_v58 = vld [vmem:[#allocation2 + $0xa68] sm:$0xf] }
 0x1a1   :  { %2103 = vmatpush.bf16.msra.mxu3 %v3804_v7  ;;  %v4558_v7 = vld [vmem:[#allocation2 + $0x700] sm:$0xf0]  ;;  %v4668_v33 = vld [vmem:[#allocation2 + $0xa70] sm:$0xf0] }
 0x1a2   :  { %2094 = vmatpush.bf16.msra.mxu2 %v3932_v13  ;;  %v4555_v13 = vld [vmem:[#allocation2 + $0x6e8] sm:$0xf0] }
 0x1a3   :  { %2119 = vmatpush.bf16.msrb.mxu0 %v3876_v20  ;;  %v3792_v20 = vor.u32 %v4570_v16, %v3791_v12  ;;  %v3731_v12 = vld [vmem:[#allocation2 + $0x6e0] sm:$0xf]  ;;  %v4621_v16 = vld [vmem:[#allocation2 + $0x8f8] sm:$0xf0] }
 0x1a4   :  { %v3732_v15 = vor.u32 %v4555_v13, %v3731_v12 }
 0x1a5   :  { %2104 = vmatpush.bf16.msra.mxu3 %v3792_v20 }
 0x1a6   :  { %2095 = vmatpush.bf16.msra.mxu2 %v3920_v36 }
 0x1a7   :  { %2120 = vmatpush.bf16.msrb.mxu0 %v3864_v42 }
 0x1a9   :  { %2105 = vmatpush.bf16.msra.mxu3 %v3780_v43  ;;  %v4644_v43 = vld [vmem:[#allocation2 + $0x9b0] sm:$0xf0] }
 0x1ab   :  { %2121 = vmatpush.bf16.msrb.mxu0 %v3852_v56  ;;  %v3908_v56 = vor.u32 %v4598_v48, %v3905_v50  ;;  %v3959_v48 = vld [vmem:[#allocation2 + $0x8a8] sm:$0xf]  ;;  %v4612_v50 = vld [vmem:[#allocation2 + $0x8b0] sm:$0xf0] }
 0x1ad   :  { %2096 = vmatpush.bf16.msra.mxu2 %v3908_v56  ;;  %2106 = vmatpush.bf16.msra.mxu3 %v3768_v59  ;;  %v4059_v56 = vld [vmem:[#allocation2 + $0x978] sm:$0xf] }
 0x1ae   :  { %v4060_v1 = vor.u32 %v4638_v57, %v4059_v56  ;;  %v4049_v56 = vld [vmem:[#allocation2 + $0x96c] sm:$0xf0] }
 0x1af   :  { %2122 = vmatpush.bf16.msrb.mxu0 %v3840_v8 }
 0x1b1   :  { %2107 = vmatpush.bf16.msra.mxu3 %v3756_v4  ;;  %v4047_v4 = vld [vmem:[#allocation2 + $0x960] sm:$0xf] }
 0x1b3   :  { %2123 = vmatpush.bf16.msrb.mxu0 %v3828_v21  ;;  %v4618_v21 = vld [vmem:[#allocation2 + $0x8e0] sm:$0xf0] }
 0x1b7   :  { %2124 = vmatpush.bf16.msrb.mxu0 %v3816_v44  ;;  %v4071_v44 = vld [vmem:[#allocation2 + $0x990] sm:$0xf] }
 0x1cd   :  { %v4862_v51 = vpop.f32.mrf.mxu0 }
 0x1ce   :  { %v1398_v53 = vadd.f32 %v4862_v51, %v998_v22 }
 0x1d3   :  { %v1439_v60 = vpop.f32.mrf.mxu3 }
 0x1d4   :  { %v1440_v35 = vadd.f32 %v1439_v60, %v999_v9 }
 0x1d5   :  { %v4864_v31 = vpop.f32.mrf.mxu0 }
 0x1d6   :  { %v1400_v62 = vadd.f32 %v4864_v31, %v998_v22 }
 0x1db   :  { %v4866_v32 = vpop.f32.mrf.mxu1  ;;  %v1441_v42 = vpop.f32.mrf.mxu3 }
 0x1dc   :  { %v1442_v54 = vadd.f32 %v1441_v42, %v999_v9  ;;  %v1412_v60 = vadd.f32 %v4866_v32, %v1398_v53  ;;  %v4083_v42 = vld [vmem:[#allocation2 + $0x9a8] sm:$0xf] }
 0x1dd   :  { %v1453_v6 = vpop.f32.mrf.mxu0 }
 0x1de   :  { %v1454_v30 = vadd.f32 %v1453_v6, %v1440_v35  ;;  %v3743_v6 = vld [vmem:[#allocation2 + $0x6f8] sm:$0xf] }
 0x1df   :  { %v3744_v9 = vor.u32 %v4558_v7, %v3743_v6  ;;  %v4635_v6 = vld [vmem:[#allocation2 + $0x968] sm:$0xf0] }
 0x1e1   :  { %2108 = vmatpush.bf16.msra.mxu3 %v3744_v9  ;;  %v4606_v9 = vld [vmem:[#allocation2 + $0x880] sm:$0xf0] }
 0x1e3   :  { %v4868_v61 = vpop.f32.mrf.mxu1  ;;  %v1495_v22 = vpop.f32.mrf.mxu3 }
 0x1e4   :  { %v1414_v8 = vadd.f32 %v4868_v61, %v1400_v62  ;;  %v3995_v61 = vld [vmem:[#allocation2 + $0x8f0] sm:$0xf] }
 0x1e5   :  { %v1455_v46 = vpop.f32.mrf.mxu0  ;;  %v3996_v20 = vor.u32 %v4621_v16, %v3995_v61  ;;  %2109 = vmatpush.bf16.msra.mxu3 %v3732_v15  ;;  %v3947_v62 = vld [vmem:[#allocation2 + $0x890] sm:$0xf]  ;;  %v3911_v16 = vld [vmem:[#allocation2 + $0x848] sm:$0xf]  ;;  %v4600_v15 = vld [vmem:[#allocation2 + $0x850] sm:$0xf0] }
 0x1e6   :  { %v1456_v49 = vadd.f32 %v1455_v46, %v1442_v54  ;;  %v4084_v46 = vor.u32 %v4644_v43, %v4083_v42  ;;  %v4167_v42 = vld [vmem:[#allocation2 + $0xa50] sm:$0xf]  ;;  %v4665_v43 = vld [vmem:[#allocation2 + $0xa58] sm:$0xf0] }
 0x1e9   :  { %2110 = vmatpush.bf16.msra.mxu3 %v3720_v5  ;;  %v4180_v5 = vor.u32 %v4668_v33, %v4179_v58 }
 0x1eb   :  { %v1467_v29 = vpop.f32.mrf.mxu1  ;;  %v1497_v59 = vpop.f32.mrf.mxu3 }
 0x1ec   :  { %v1468_v55 = vadd.f32 %v1467_v29, %v1454_v30  ;;  %v3972_v30 = vor.u32 %v4615_v40, %v3971_v37  ;;  %v4023_v37 = vld [vmem:[#allocation2 + $0x930] sm:$0xf]  ;;  %v4629_v40 = vld [vmem:[#allocation2 + $0x938] sm:$0xf0] }
 0x1ed   :  { %v1509_v35 = vpop.f32.mrf.mxu0 }
 0x1ee   :  { %v4879_v2 = vadd.f32 %v1468_v55, %v265_v23 }
 0x1ef   :  { %v1425_v47 = vpop.f32.mrf.mxu2 }
 0x1f0   :  { %v1426_v51 = vadd.f32 %v1425_v47, %v1412_v60  ;;  %v1521_v10 = vmax.f32 %v4879_v2, 0.0  ;;  %v4641_v47 = vld [vmem:[#allocation2 + $0x998] sm:$0xf0]  ;;  %v3960_v60 = vor.u32 %v4612_v50, %v3959_v48  ;;  %v4626_v48 = vld [vmem:[#allocation2 + $0x920] sm:$0xf0] }
 0x1f1   :  { %v4072_v53 = vor.u32 %v4641_v47, %v4071_v44  ;;  %v4637_v44 = vld [vmem:[#allocation2 + $0x97c] sm:$0xf]  ;;  %v4011_v47 = vld [vmem:[#allocation2 + $0x918] sm:$0xf] }
 0x1f2   :  { %v4889_v14 = vadd.f32 %v1426_v51, %v264_v25  ;;  %v4012_v50 = vor.u32 %v4626_v48, %v4011_v47 }
 0x1f3   :  { %v1469_v63 = vpop.f32.mrf.mxu1 }
 0x1f4   :  { %v1470_v3 = vadd.f32 %v1469_v63, %v1456_v49  ;;  %v1520_v25 = vmax.f32 %v4889_v14, 0.0  ;;  %v4609_v63 = vld [vmem:[#allocation2 + $0x898] sm:$0xf0] }
 0x1f5   :  { %v1511_v0 = vpop.f32.mrf.mxu0  ;;  %v3948_v7 = vor.u32 %v4609_v63, %v3947_v62  ;;  %v4143_v62 = vld [vmem:[#allocation2 + $0xa20] sm:$0xf]  ;;  %v4659_v63 = vld [vmem:[#allocation2 + $0xa28] sm:$0xf0] }
 0x1f6   :  { %v4884_v32 = vadd.f32 %v1470_v3, %v268_v28 }
 0x1f7   :  { %v1427_v31 = vpop.f32.mrf.mxu2 }
 0x1f8   :  { %v1524_v23 = vmax.f32 %v4884_v32, 0.0  ;;  %v1428_v11 = vadd.f32 %v1427_v31, %v1414_v8  ;;  %v3935_v31 = vld [vmem:[#allocation2 + $0x878] sm:$0xf] }
 0x1f9   :  { %v3936_v27 = vor.u32 %v4606_v9, %v3935_v31  ;;  %v4131_v9 = vld [vmem:[#allocation2 + $0xa08] sm:$0xf] }
 0x1fa   :  { %v4896_v24 = vpack.c.bf16 %v1524_v23, %v1521_v10  ;;  %v4900_v28 = vadd.f32 %v1428_v11, %v267_v26  ;;  %v3983_v26 = vld [vmem:[#allocation2 + $0x8d8] sm:$0xf]  ;;  %v4048_v11 = vor.u32 %v4635_v6, %v4047_v4  ;;  %v4667_v4 = vld [vmem:[#allocation2 + $0xa6c] sm:$0xf] }
 0x1fb   :  { %v3984_v36 = vor.u32 %v4618_v21, %v3983_v26  ;;  %v4035_v21 = vld [vmem:[#allocation2 + $0x948] sm:$0xf]  ;;  %v4181_v6 = vld [vmem:[#allocation2 + $0xa74] sm:$0xf0] }
 0x1fc   :  { %v1523_v17 = vmax.f32 %v4900_v28, 0.0  ;;  %2041 = vmatmul.bf16.vlgmr.msrb.gmra.mxu2 %v4896_v24  ;;  %v4184_v31 = vor.u32 %v4667_v4, %v4181_v6  ;;  %v4691_v4 = vld [vmem:[#allocation2 + $0xb2c] sm:$0xf]  ;;  %v4277_v6 = vld [vmem:[#allocation2 + $0xb34] sm:$0xf0] }
 0x1fd   :  { %2644 = vmatpush.bf16.msrb.mxu2 %v4084_v46 }
 0x1fe   :  { %v4910_v19 = vpack.c.bf16 %v1523_v17, %v1520_v25 }
 0x1ff   :  { %v1481_v29 = vpop.f32.mrf.mxu2 }
 0x200   :  { %v1482_v34 = vadd.f32 %v1481_v29, %v1000_v18  ;;  %2027 = vmatmul.bf16.vlgmr.msrb.gmra.mxu1 %v4910_v19  ;;  %2069 = vmatmul.bf16.vlgmr.msra.gmra.mxu0 %v4910_v19 }
 0x201   :  { %2131 = vmatpush.bf16.msrb.mxu1 %v3996_v20  ;;  %2645 = vmatpush.bf16.msrb.mxu2 %v4072_v53  ;;  %v4085_v20 = vld [vmem:[#allocation2 + $0x9b4] sm:$0xf0]  ;;  %v4662_v53 = vld [vmem:[#allocation2 + $0xa40] sm:$0xf0] }
 0x202   :  { %v1496_v41 = vadd.f32 %v1495_v22, %v1482_v34  ;;  %v4632_v22 = vld [vmem:[#allocation2 + $0x950] sm:$0xf0] }
 0x203   :  { %v4036_v29 = vor.u32 %v4632_v22, %v4035_v21  ;;  %v4640_v34 = vld [vmem:[#allocation2 + $0x994] sm:$0xf]  ;;  %v4653_v21 = vld [vmem:[#allocation2 + $0x9f8] sm:$0xf0]  ;;  %v4263_v22 = vld [vmem:[#allocation2 + $0xb10] sm:$0xf] }
 0x204   :  { %v1510_v54 = vadd.f32 %v1509_v35, %v1496_v41  ;;  %v4073_v35 = vld [vmem:[#allocation2 + $0x99c] sm:$0xf0]  ;;  %v4024_v41 = vor.u32 %v4629_v40, %v4023_v37  ;;  %v4157_v37 = vld [vmem:[#allocation2 + $0xa44] sm:$0xf0] }
 0x205   :  { %2132 = vmatpush.bf16.msrb.mxu1 %v3984_v36  ;;  %2646 = vmatpush.bf16.msrb.mxu2 %v4060_v1  ;;  %v4076_v36 = vor.u32 %v4640_v34, %v4073_v35  ;;  %v4144_v1 = vor.u32 %v4659_v63, %v4143_v62  ;;  %v4625_v34 = vld [vmem:[#allocation2 + $0x91c] sm:$0xf]  ;;  %v4683_v62 = vld [vmem:[#allocation2 + $0xae8] sm:$0xf0] }
 0x206   :  { %v4916_v51 = vadd.f32 %v1510_v54, %v266_v38  ;;  %v4634_v54 = vld [vmem:[#allocation2 + $0x964] sm:$0xf]  ;;  %v4661_v35 = vld [vmem:[#allocation2 + $0xa3c] sm:$0xf]  ;;  %v4655_v63 = vld [vmem:[#allocation2 + $0xa0c] sm:$0xf] }
 0x207   :  { %v1483_v52 = vpop.f32.mrf.mxu2  ;;  %v4052_v57 = vor.u32 %v4634_v54, %v4049_v56  ;;  %v4160_v40 = vor.u32 %v4661_v35, %v4157_v37  ;;  %v4685_v35 = vld [vmem:[#allocation2 + $0xafc] sm:$0xf] }
 0x208   :  { %v1484_v55 = vadd.f32 %v1483_v52, %v1000_v18  ;;  %v1522_v12 = vmax.f32 %v4916_v51, 0.0  ;;  %v4643_v18 = vld [vmem:[#allocation2 + $0x9ac] sm:$0xf]  ;;  %v4155_v52 = vld [vmem:[#allocation2 + $0xa38] sm:$0xf] }
 0x209   :  { %2133 = vmatpush.bf16.msrb.mxu1 %v3972_v30  ;;  %2647 = vmatpush.bf16.msrb.mxu2 %v4048_v11  ;;  %v4088_v26 = vor.u32 %v4643_v18, %v4085_v20  ;;  %v4168_v30 = vor.u32 %v4665_v43, %v4167_v42  ;;  %v4656_v11 = vld [vmem:[#allocation2 + $0xa10] sm:$0xf0]  ;;  %v4169_v20 = vld [vmem:[#allocation2 + $0xa5c] sm:$0xf0]  ;;  %v4650_v42 = vld [vmem:[#allocation2 + $0x9e0] sm:$0xf0] }
 0x20a   :  { %v1498_v49 = vadd.f32 %v1497_v59, %v1484_v55  ;;  %v4156_v55 = vor.u32 %v4662_v53, %v4155_v52  ;;  %v3999_v59 = vld [vmem:[#allocation2 + $0x900] sm:$0xf]  ;;  %v4664_v18 = vld [vmem:[#allocation2 + $0xa54] sm:$0xf]  ;;  %v4251_v43 = vld [vmem:[#allocation2 + $0xaf8] sm:$0xf] }
 0x20b   :  { %v4145_v52 = vld [vmem:[#allocation2 + $0xa2c] sm:$0xf0] }
 0x20c   :  { %v1512_v3 = vadd.f32 %v1511_v0, %v1498_v49  ;;  %v4631_v0 = vld [vmem:[#allocation2 + $0x94c] sm:$0xf]  ;;  %v4187_v53 = vld [vmem:[#allocation2 + $0xa70] sm:$0xf] }
 0x20d   :  { %2134 = vmatpush.bf16.msrb.mxu1 %v3960_v60  ;;  %2648 = vmatpush.bf16.msrb.mxu2 %v4036_v29  ;;  %v4623_v60 = vld [vmem:[#allocation2 + $0x908] sm:$0xf0]  ;;  %v4689_v29 = vld [vmem:[#allocation2 + $0xb18] sm:$0xf0] }
 0x20e   :  { %v4920_v8 = vadd.f32 %v1512_v3, %v269_v45  ;;  %v4603_v45 = vld [vmem:[#allocation2 + $0x868] sm:$0xf0]  ;;  %v4000_v49 = vor.u32 %v4623_v60, %v3999_v59  ;;  %v4037_v3 = vld [vmem:[#allocation2 + $0x954] sm:$0xf0]  ;;  %v4264_v33 = vor.u32 %v4689_v29, %v4263_v22  ;;  %v4239_v60 = vld [vmem:[#allocation2 + $0xae0] sm:$0xf] }
 0x20f   :  { %v3924_v61 = vor.u32 %v4603_v45, %v3923_v39  ;;  %v4692_v39 = vld [vmem:[#allocation2 + $0xb30] sm:$0xf0]  ;;  %v4647_v59 = vld [vmem:[#allocation2 + $0x9c8] sm:$0xf0]  ;;  %v4215_v29 = vld [vmem:[#allocation2 + $0xab0] sm:$0xf] }
 0x210   :  { %v1525_v13 = vmax.f32 %v4920_v8, 0.0  ;;  %2083 = vmatmul.bf16.vlgmr.msra.gmra.mxu1 %v4896_v24  ;;  %2125 = vmatmul.bf16.vlgmr.msrb.gmra.mxu0 %v4896_v24  ;;  %v3912_v24 = vor.u32 %v4600_v15, %v3911_v16  ;;  %v4628_v45 = vld [vmem:[#allocation2 + $0x934] sm:$0xf] }
 0x211   :  { %2135 = vmatpush.bf16.msrb.mxu1 %v3948_v7  ;;  %2649 = vmatpush.bf16.msrb.mxu2 %v4024_v41  ;;  %v4040_v7 = vor.u32 %v4631_v0, %v4037_v3  ;;  %v4107_v41 = vld [vmem:[#allocation2 + $0x9d8] sm:$0xf] }
 0x212   :  { %v1528_v38 = vpack.c.bf16 %v1525_v13, %v1522_v12  ;;  %v4133_v0 = vld [vmem:[#allocation2 + $0xa14] sm:$0xf0] }
 0x213   :  { %v4136_v3 = vor.u32 %v4655_v63, %v4133_v0  ;;  %v4679_v63 = vld [vmem:[#allocation2 + $0xacc] sm:$0xf]  ;;  %v4229_v0 = vld [vmem:[#allocation2 + $0xad4] sm:$0xf0] }
 0x214   :  { %2055 = vmatmul.bf16.vlgmr.msrb.gmra.mxu3 %v1528_v38  ;;  %2097 = vmatmul.bf16.vlgmr.msra.gmra.mxu2 %v1528_v38 }
 0x215   :  { %2136 = vmatpush.bf16.msrb.mxu1 %v3936_v27  ;;  %2658 = vmatpush.bf16.msrb.mxu3 %v4180_v5  ;;  %v4275_v27 = vld [vmem:[#allocation2 + $0xb28] sm:$0xf] }
 0x216   :  { %2650 = vmatpush.bf16.msrb.mxu2 %v4012_v50  ;;  %v4276_v16 = vor.u32 %v4692_v39, %v4275_v27  ;;  %v4013_v5 = vld [vmem:[#allocation2 + $0x924] sm:$0xf0]  ;;  %v4658_v50 = vld [vmem:[#allocation2 + $0xa24] sm:$0xf]  ;;  %v4652_v39 = vld [vmem:[#allocation2 + $0x9f4] sm:$0xf] }
 0x217   :  { %v4148_v54 = vor.u32 %v4658_v50, %v4145_v52  ;;  %v4227_v27 = vld [vmem:[#allocation2 + $0xac8] sm:$0xf]  ;;  %v4682_v50 = vld [vmem:[#allocation2 + $0xae4] sm:$0xf]  ;;  %v4241_v52 = vld [vmem:[#allocation2 + $0xaec] sm:$0xf0] }
 0x218   :  { %2672 = vmatpush.bf16.msra.mxu0 %v4276_v16  ;;  %v4121_v16 = vld [vmem:[#allocation2 + $0x9fc] sm:$0xf0] }
 0x219   :  { %2137 = vmatpush.bf16.msrb.mxu1 %v3924_v61  ;;  %2659 = vmatpush.bf16.msrb.mxu3 %v4168_v30  ;;  %v4025_v61 = vld [vmem:[#allocation2 + $0x93c] sm:$0xf0]  ;;  %v4686_v30 = vld [vmem:[#allocation2 + $0xb00] sm:$0xf0] }
 0x21a   :  { %2651 = vmatpush.bf16.msrb.mxu2 %v4000_v49  ;;  %v4028_v15 = vor.u32 %v4628_v45, %v4025_v61  ;;  %v4252_v47 = vor.u32 %v4686_v30, %v4251_v43  ;;  %v4674_v30 = vld [vmem:[#allocation2 + $0xaa0] sm:$0xf0] }
 0x21c   :  { %2673 = vmatpush.bf16.msra.mxu0 %v4264_v33  ;;  %v4649_v33 = vld [vmem:[#allocation2 + $0x9dc] sm:$0xf] }
 0x21d   :  { %2138 = vmatpush.bf16.msrb.mxu1 %v3912_v24  ;;  %2660 = vmatpush.bf16.msrb.mxu3 %v4156_v55  ;;  %v4119_v24 = vld [vmem:[#allocation2 + $0x9f0] sm:$0xf]  ;;  %v4669_v55 = vld [vmem:[#allocation2 + $0xa78] sm:$0xf0] }
 0x21e   :  { %2700 = vmatpush.bf16.msra.mxu2 %v4184_v31  ;;  %v4120_v58 = vor.u32 %v4653_v21, %v4119_v24  ;;  %v4188_v56 = vor.u32 %v4669_v55, %v4187_v53  ;;  %v4280_v31 = vor.u32 %v4691_v4, %v4277_v6  ;;  %v4663_v21 = vld [vmem:[#allocation2 + $0xa48] sm:$0xf0]  ;;  %v4139_v55 = vld [vmem:[#allocation2 + $0xa10] sm:$0xf]  ;;  %v4645_v4 = vld [vmem:[#allocation2 + $0x9b8] sm:$0xf0] }
 0x21f   :  { %v4127_v6 = vld [vmem:[#allocation2 + $0x9f8] sm:$0xf] }
 0x220   :  { %2139 = vmatmul.bf16.vlgmr.msrb.gmra.mxu1 %v1528_v38  ;;  %v4132_v38 = vor.u32 %v4656_v11, %v4131_v9  ;;  %2674 = vmatpush.bf16.msra.mxu0 %v4252_v47  ;;  %v4666_v9 = vld [vmem:[#allocation2 + $0xa60] sm:$0xf0] }
 0x221   :  { %2686 = vmatpush.bf16.msra.mxu1 %v4088_v26  ;;  %2661 = vmatpush.bf16.msrb.mxu3 %v4144_v1  ;;  %v4172_v26 = vor.u32 %v4664_v18, %v4169_v20  ;;  %v4240_v1 = vor.u32 %v4683_v62, %v4239_v60  ;;  %v4265_v18 = vld [vmem:[#allocation2 + $0xb1c] sm:$0xf0]  ;;  %v4124_v20 = vor.u32 %v4652_v39, %v4121_v16 }
 0x222   :  { %v4191_v60 = vld [vmem:[#allocation2 + $0xa80] sm:$0xf] }
 0x223   :  { %2701 = vmatpush.bf16.msra.mxu2 %v4172_v26  ;;  %v4163_v26 = vld [vmem:[#allocation2 + $0xa40] sm:$0xf] }
 0x224   :  { %2111 = vmatmul.bf16.vlgmr.msra.gmra.mxu3 %v4910_v19  ;;  %v4061_v19 = vld [vmem:[#allocation2 + $0x984] sm:$0xf0]  ;;  %2675 = vmatpush.bf16.msra.mxu0 %v4240_v1  ;;  %v4164_v22 = vor.u32 %v4663_v21, %v4163_v26  ;;  %v4091_v1 = vld [vmem:[#allocation2 + $0x9b0] sm:$0xf]  ;;  %v4115_v16 = vld [vmem:[#allocation2 + $0x9e0] sm:$0xf] }
 0x225   :  { %2687 = vmatpush.bf16.msra.mxu1 %v4076_v36  ;;  %v4064_v46 = vor.u32 %v4637_v44, %v4061_v19  ;;  %2662 = vmatpush.bf16.msrb.mxu3 %v4132_v38  ;;  %v4016_v36 = vor.u32 %v4625_v34, %v4013_v5  ;;  %v4108_v44 = vor.u32 %v4650_v42, %v4107_v41  ;;  %v4622_v19 = vld [vmem:[#allocation2 + $0x904] sm:$0xf]  ;;  %v4680_v38 = vld [vmem:[#allocation2 + $0xad0] sm:$0xf0]  ;;  %v4109_v5 = vld [vmem:[#allocation2 + $0x9e4] sm:$0xf0] }
 0x226   :  { %v4228_v61 = vor.u32 %v4680_v38, %v4227_v27  ;;  %v4112_v37 = vor.u32 %v4649_v33, %v4109_v5  ;;  %v4151_v41 = vld [vmem:[#allocation2 + $0xa28] sm:$0xf]  ;;  %v4660_v42 = vld [vmem:[#allocation2 + $0xa30] sm:$0xf0]  ;;  %v4217_v27 = vld [vmem:[#allocation2 + $0xabc] sm:$0xf0] }
 0x227   :  { %2702 = vmatpush.bf16.msra.mxu2 %v4160_v40  ;;  %v4152_v43 = vor.u32 %v4660_v42, %v4151_v41  ;;  %v4079_v38 = vld [vmem:[#allocation2 + $0x998] sm:$0xf]  ;;  %v4937_v21 = vld [vmem:[#allocation4 + $0x9] sm:$0x7]  ;;  %v4067_v33 = vld [vmem:[#allocation2 + $0x980] sm:$0xf] }
 0x228   :  { %2676 = vmatpush.bf16.msra.mxu0 %v4228_v61  ;;  %v4642_v61 = vld [vmem:[#allocation2 + $0x9a0] sm:$0xf0]  ;;  %v4639_v5 = vld [vmem:[#allocation2 + $0x988] sm:$0xf0]  ;;  %v1629_v41 = vperm.slane %v4937_v21, 0 }
 0x229   :  { %2688 = vmatpush.bf16.msra.mxu1 %v4064_v46  ;;  %2663 = vmatpush.bf16.msrb.mxu3 %v4120_v58  ;;  %v4001_v46 = vld [vmem:[#allocation2 + $0x90c] sm:$0xf0]  ;;  %v4677_v58 = vld [vmem:[#allocation2 + $0xab8] sm:$0xf0]  ;;  %v4670_v42 = vld [vmem:[#allocation2 + $0xa84] sm:$0xf] }
 0x22a   :  { %v4004_v48 = vor.u32 %v4622_v19, %v4001_v46  ;;  %v4216_v34 = vor.u32 %v4677_v58, %v4215_v29  ;;  %v4646_v19 = vld [vmem:[#allocation2 + $0x9c4] sm:$0xf]  ;;  %v4673_v29 = vld [vmem:[#allocation2 + $0xa9c] sm:$0xf]  ;;  %v4205_v58 = vld [vmem:[#allocation2 + $0xaa4] sm:$0xf0] }
 0x22b   :  { %2703 = vmatpush.bf16.msra.mxu2 %v4148_v54  ;;  %v4244_v54 = vor.u32 %v4682_v50, %v4241_v52 }
 0x22c   :  { %2677 = vmatpush.bf16.msra.mxu0 %v4216_v34  ;;  %v4208_v34 = vor.u32 %v4673_v29, %v4205_v58 }
 0x22d   :  { %2689 = vmatpush.bf16.msra.mxu1 %v4052_v57  ;;  %2664 = vmatpush.bf16.msrb.mxu3 %v4108_v44  ;;  %v4095_v57 = vld [vmem:[#allocation2 + $0x9c0] sm:$0xf]  ;;  %v4203_v44 = vld [vmem:[#allocation2 + $0xa98] sm:$0xf] }
 0x22e   :  { %v4096_v49 = vor.u32 %v4647_v59, %v4095_v57  ;;  %v4204_v47 = vor.u32 %v4674_v30, %v4203_v44  ;;  %v4055_v44 = vld [vmem:[#allocation2 + $0x968] sm:$0xf]  ;;  %v1630_v30 = vperm.slane %v4937_v21, 1 }
 0x22f   :  { %2704 = vmatpush.bf16.msra.mxu2 %v4136_v3  ;;  %v4232_v3 = vor.u32 %v4679_v63, %v4229_v0  ;;  %v4031_v63 = vld [vmem:[#allocation2 + $0x938] sm:$0xf]  ;;  %v4630_v0 = vld [vmem:[#allocation2 + $0x940] sm:$0xf0] }
 0x230   :  { %2678 = vmatpush.bf16.msra.mxu0 %v4204_v47  ;;  %v4636_v47 = vld [vmem:[#allocation2 + $0x970] sm:$0xf0] }
 0x231   :  { %2690 = vmatpush.bf16.msra.mxu1 %v4040_v7  ;;  %v4175_v7 = vld [vmem:[#allocation2 + $0xa58] sm:$0xf]  ;;  %2665 = vmatpush.bf16.msrb.mxu3 %v4096_v49  ;;  %v4671_v49 = vld [vmem:[#allocation2 + $0xa88] sm:$0xf0]  ;;  %v4056_v52 = vor.u32 %v4636_v47, %v4055_v44 }
 0x232   :  { %v4176_v11 = vor.u32 %v4666_v9, %v4175_v7  ;;  %v4192_v62 = vor.u32 %v4671_v49, %v4191_v60  ;;  %v4654_v7 = vld [vmem:[#allocation2 + $0xa00] sm:$0xf0]  ;;  %v4687_v44 = vld [vmem:[#allocation2 + $0xb08] sm:$0xf0] }
 0x233   :  { %2705 = vmatpush.bf16.msra.mxu2 %v4124_v20  ;;  %v4128_v9 = vor.u32 %v4654_v7, %v4127_v6  ;;  %v4032_v6 = vor.u32 %v4630_v0, %v4031_v63 }
 0x234   :  { %2679 = vmatpush.bf16.msra.mxu0 %v4192_v62 }
 0x235   :  { %2691 = vmatpush.bf16.msra.mxu1 %v4028_v15  ;;  %2714 = vmatpush.bf16.msra.mxu3 %v4280_v31  ;;  %v4688_v15 = vld [vmem:[#allocation2 + $0xb14] sm:$0xf]  ;;  %v4092_v31 = vor.u32 %v4645_v4, %v4091_v1 }
 0x236   :  { %v4268_v24 = vor.u32 %v4688_v15, %v4265_v18  ;;  %v4651_v15 = vld [vmem:[#allocation2 + $0x9e8] sm:$0xf0] }
 0x237   :  { %2706 = vmatpush.bf16.msra.mxu2 %v4112_v37  ;;  %v4116_v26 = vor.u32 %v4651_v15, %v4115_v16  ;;  %v4068_v37 = vor.u32 %v4639_v5, %v4067_v33  ;;  %v4283_v16 = vld [vmem:[#allocation2 + $0xb30] sm:$0xf]  ;;  %v4693_v15 = vld [vmem:[#allocation2 + $0xb38] sm:$0xf0]  ;;  %v4271_v33 = vld [vmem:[#allocation2 + $0xb18] sm:$0xf] }
 0x238   :  { %2728 = vmatpush.bf16.msrb.mxu0 %v4092_v31  ;;  %v4284_v29 = vor.u32 %v4693_v15, %v4283_v16  ;;  %v4007_v5 = vld [vmem:[#allocation2 + $0x908] sm:$0xf]  ;;  %v4311_v15 = vld [vmem:[#allocation2 + $0xbd0] sm:$0xf] }
 0x239   :  { %2692 = vmatpush.bf16.msra.mxu1 %v4016_v36  ;;  %2715 = vmatpush.bf16.msra.mxu3 %v4268_v24  ;;  %v4253_v36 = vld [vmem:[#allocation2 + $0xb04] sm:$0xf0]  ;;  %v4080_v24 = vor.u32 %v4642_v61, %v4079_v38  ;;  %v4019_v38 = vld [vmem:[#allocation2 + $0x920] sm:$0xf] }
 0x23a   :  { %v4256_v40 = vor.u32 %v4685_v35, %v4253_v36  ;;  %v4103_v35 = vld [vmem:[#allocation2 + $0x9c8] sm:$0xf]  ;;  %v4648_v36 = vld [vmem:[#allocation2 + $0x9d0] sm:$0xf0] }
 0x23c   :  { %2729 = vmatpush.bf16.msrb.mxu0 %v4080_v24 }
 0x23d   :  { %2693 = vmatpush.bf16.msra.mxu1 %v4004_v48  ;;  %2716 = vmatpush.bf16.msra.mxu3 %v4256_v40  ;;  %v4097_v48 = vld [vmem:[#allocation2 + $0x9cc] sm:$0xf0]  ;;  %v4104_v40 = vor.u32 %v4648_v36, %v4103_v35  ;;  %v4624_v35 = vld [vmem:[#allocation2 + $0x910] sm:$0xf0]  ;;  %v1631_v36 = vperm.slane %v4937_v21, 2 }
 0x23e   :  { %v4100_v53 = vor.u32 %v4646_v19, %v4097_v48 }
 0x240   :  { %2707 = vmatpush.bf16.msra.mxu2 %v4100_v53  ;;  %2730 = vmatpush.bf16.msrb.mxu0 %v4068_v37  ;;  %v4008_v37 = vor.u32 %v4624_v35, %v4007_v5  ;;  %v4708_v5 = vld [vmem:[#allocation2 + $0xc98] sm:$0xf0] }
 0x241   :  { %2742 = vmatpush.bf16.msrb.mxu1 %v4188_v56  ;;  %v4657_v56 = vld [vmem:[#allocation2 + $0xa18] sm:$0xf0]  ;;  %2717 = vmatpush.bf16.msra.mxu3 %v4244_v54 }
 0x242   :  { %v4140_v59 = vor.u32 %v4657_v56, %v4139_v55  ;;  %v4043_v55 = vld [vmem:[#allocation2 + $0x950] sm:$0xf]  ;;  %v4633_v56 = vld [vmem:[#allocation2 + $0x958] sm:$0xf0] }
 0x243   :  { %v4044_v49 = vor.u32 %v4633_v56, %v4043_v55  ;;  %v4235_v55 = vld [vmem:[#allocation2 + $0xad0] sm:$0xf]  ;;  %v4681_v56 = vld [vmem:[#allocation2 + $0xad8] sm:$0xf0] }
 0x244   :  { %2731 = vmatpush.bf16.msrb.mxu0 %v4056_v52  ;;  %v4236_v63 = vor.u32 %v4681_v56, %v4235_v55  ;;  %v4331_v56 = vld [vmem:[#allocation2 + $0xc48] sm:$0xf] }
 0x245   :  { %2743 = vmatpush.bf16.msrb.mxu1 %v4176_v11  ;;  %2718 = vmatpush.bf16.msra.mxu3 %v4232_v3  ;;  %v4676_v11 = vld [vmem:[#allocation2 + $0xab4] sm:$0xf] }
 0x246   :  { %v4220_v39 = vor.u32 %v4676_v11, %v4217_v27 }
 0x248   :  { %2732 = vmatpush.bf16.msrb.mxu0 %v4044_v49 }
 0x249   :  { %2744 = vmatpush.bf16.msrb.mxu1 %v4164_v22  ;;  %2719 = vmatpush.bf16.msra.mxu3 %v4220_v39  ;;  %v4627_v39 = vld [vmem:[#allocation2 + $0x928] sm:$0xf0] }
 0x24c   :  { %2733 = vmatpush.bf16.msrb.mxu0 %v4032_v6 }
 0x24d   :  { %2745 = vmatpush.bf16.msrb.mxu1 %v4152_v43  ;;  %2720 = vmatpush.bf16.msra.mxu3 %v4208_v34  ;;  %v4193_v43 = vld [vmem:[#allocation2 + $0xa8c] sm:$0xf0]  ;;  %v4690_v34 = vld [vmem:[#allocation2 + $0xb20] sm:$0xf0] }
 0x24e   :  { %v4196_v19 = vor.u32 %v4670_v42, %v4193_v43  ;;  %v4272_v42 = vor.u32 %v4690_v34, %v4271_v33  ;;  %v4259_v43 = vld [vmem:[#allocation2 + $0xb00] sm:$0xf]  ;;  %v4343_v34 = vld [vmem:[#allocation2 + $0xc90] sm:$0xf] }
 0x24f   :  { %v4260_v47 = vor.u32 %v4687_v44, %v4259_v43  ;;  %v4344_v35 = vor.u32 %v4708_v5, %v4343_v34  ;;  %v4299_v43 = vld [vmem:[#allocation2 + $0xb88] sm:$0xf]  ;;  %v4697_v44 = vld [vmem:[#allocation2 + $0xb90] sm:$0xf0]  ;;  %v4359_v5 = vld [vmem:[#allocation2 + $0xcf0] sm:$0xf] }
 0x251   :  { %2746 = vmatpush.bf16.msrb.mxu1 %v4140_v59  ;;  %2721 = vmatpush.bf16.msra.mxu3 %v4196_v19 }
 0x255   :  { %2747 = vmatpush.bf16.msrb.mxu1 %v4128_v9 }
 0x259   :  { %2748 = vmatpush.bf16.msrb.mxu1 %v4116_v26 }
 0x25d   :  { %2749 = vmatpush.bf16.msrb.mxu1 %v4104_v40 }
 0x27d   :  { %v4931_v45 = vpop.f32.mrf.mxu1  ;;  %v2070_v18 = vpop.f32.mrf.mxu0 }
 0x27e   :  { %v2029_v53 = vadd.f32 %v4931_v45, %v1629_v41  ;;  %v2071_v59 = vadd.f32 %v2070_v18, %v1630_v30  ;;  %v4020_v18 = vor.u32 %v4627_v39, %v4019_v38  ;;  %v4672_v38 = vld [vmem:[#allocation2 + $0xa90] sm:$0xf0] }
 0x27f   :  { %v4933_v46 = vpop.f32.mrf.mxu2 }
 0x280   :  { %v2043_v1 = vadd.f32 %v4933_v46, %v2029_v53  ;;  %2734 = vmatpush.bf16.msrb.mxu0 %v4020_v18  ;;  %v4700_v18 = vld [vmem:[#allocation2 + $0xbd8] sm:$0xf0] }
 0x284   :  { %2735 = vmatpush.bf16.msrb.mxu0 %v4008_v37 }
 0x285   :  { %v4935_v57 = vpop.f32.mrf.mxu1  ;;  %v2072_v54 = vpop.f32.mrf.mxu0 }
 0x286   :  { %v2031_v60 = vadd.f32 %v4935_v57, %v1629_v41  ;;  %v2073_v3 = vadd.f32 %v2072_v54, %v1630_v30 }
 0x287   :  { %v2044_v20 = vpop.f32.mrf.mxu2 }
 0x288   :  { %v2045_v7 = vadd.f32 %v2044_v20, %v2031_v60 }
 0x28d   :  { %v2084_v22 = vpop.f32.mrf.mxu1  ;;  %v2126_v40 = vpop.f32.mrf.mxu0 }
 0x28e   :  { %v2085_v4 = vadd.f32 %v2084_v22, %v2071_v59 }
 0x295   :  { %v2086_v62 = vpop.f32.mrf.mxu1  ;;  %v2128_v59 = vpop.f32.mrf.mxu0 }
 0x296   :  { %v2087_v45 = vadd.f32 %v2086_v62, %v2073_v3  ;;  %v4678_v3 = vld [vmem:[#allocation2 + $0xac0] sm:$0xf0] }
 0x297   :  { %v2056_v48 = vpop.f32.mrf.mxu3  ;;  %v2098_v50 = vpop.f32.mrf.mxu2 }
 0x298   :  { %v2057_v31 = vadd.f32 %v2056_v48, %v2043_v1  ;;  %v2099_v9 = vadd.f32 %v2098_v50, %v2085_v4  ;;  %v4247_v48 = vld [vmem:[#allocation2 + $0xae8] sm:$0xf]  ;;  %v4684_v50 = vld [vmem:[#allocation2 + $0xaf0] sm:$0xf0]  ;;  %v4223_v1 = vld [vmem:[#allocation2 + $0xab8] sm:$0xf] }
 0x299   :  { %v4248_v54 = vor.u32 %v4684_v50, %v4247_v48  ;;  %v4295_v50 = vld [vmem:[#allocation2 + $0xb70] sm:$0xf] }
 0x29a   :  { %v2145_v24 = vmax.f32 %v2057_v31, 0.0  ;;  %v2146_v46 = vmax.f32 %v2099_v9, 0.0  ;;  %v4211_v31 = vld [vmem:[#allocation2 + $0xaa0] sm:$0xf]  ;;  %v4675_v9 = vld [vmem:[#allocation2 + $0xaa8] sm:$0xf0] }
 0x29d   :  { %v2140_v30 = vpop.f32.mrf.mxu1 }
 0x29f   :  { %v2058_v11 = vpop.f32.mrf.mxu3  ;;  %v2100_v27 = vpop.f32.mrf.mxu2 }
 0x2a0   :  { %v2059_v61 = vadd.f32 %v2058_v11, %v2045_v7  ;;  %v2101_v57 = vadd.f32 %v2100_v27, %v2087_v45  ;;  %v4224_v7 = vor.u32 %v4678_v3, %v4223_v1  ;;  %v4212_v11 = vor.u32 %v4675_v9, %v4211_v31  ;;  %v4199_v27 = vld [vmem:[#allocation2 + $0xa88] sm:$0xf]  ;;  %v4716_v1 = vld [vmem:[#allocation2 + $0xd58] sm:$0xf0]  ;;  %v4694_v31 = vld [vmem:[#allocation2 + $0xb48] sm:$0xf0] }
 0x2a1   :  { %v4200_v39 = vor.u32 %v4672_v38, %v4199_v27  ;;  %v4371_v9 = vld [vmem:[#allocation2 + $0xd38] sm:$0xf]  ;;  %v4715_v27 = vld [vmem:[#allocation2 + $0xd40] sm:$0xf0] }
 0x2a2   :  { %v2148_v26 = vmax.f32 %v2059_v61, 0.0  ;;  %v2149_v22 = vmax.f32 %v2101_v57, 0.0  ;;  %v4315_v61 = vld [vmem:[#allocation2 + $0xbe8] sm:$0xf]  ;;  %v4701_v57 = vld [vmem:[#allocation2 + $0xbf0] sm:$0xf0]  ;;  %v4372_v38 = vor.u32 %v4715_v27, %v4371_v9 }
 0x2a3   :  { %v4316_v16 = vor.u32 %v4701_v57, %v4315_v61  ;;  %v4703_v61 = vld [vmem:[#allocation2 + $0xc20] sm:$0xf0] }
 0x2a4   :  { %v2151_v58 = vpack.c.bf16 %v2148_v26, %v2145_v24  ;;  %v2152_v20 = vpack.c.bf16 %v2149_v22, %v2146_v46  ;;  %v4312_v24 = vor.u32 %v4700_v18, %v4311_v15  ;;  %v4347_v46 = vld [vmem:[#allocation2 + $0xca8] sm:$0xf]  ;;  %v4709_v26 = vld [vmem:[#allocation2 + $0xcb0] sm:$0xf0]  ;;  %v4714_v15 = vld [vmem:[#allocation2 + $0xd28] sm:$0xf0] }
 0x2a5   :  { %v2142_v62 = vpop.f32.mrf.mxu1  ;;  %v4348_v22 = vor.u32 %v4709_v26, %v4347_v46  ;;  %v4319_v46 = vld [vmem:[#allocation2 + $0xc00] sm:$0xf]  ;;  %v4702_v26 = vld [vmem:[#allocation2 + $0xc08] sm:$0xf0] }
 0x2a6   :  { %2652 = vmatmul.bf16.vlgmr.msrb.gmra.mxu2 %v2151_v58  ;;  %2666 = vmatmul.bf16.vlgmr.msrb.gmra.mxu3 %v2152_v20 }
 0x2a7   :  { %2694 = vmatmul.bf16.vlgmr.msra.gmra.mxu1 %v2151_v58  ;;  %v2112_v41 = vpop.f32.mrf.mxu3  ;;  %2756 = vmatpush.bf16.msrb.mxu2 %v4284_v29  ;;  %v4307_v29 = vld [vmem:[#allocation2 + $0xbb8] sm:$0xf] }
 0x2a8   :  { %v2113_v19 = vadd.f32 %v2112_v41, %v1631_v36  ;;  %2983 = vmatpush.bf16.msrb.mxu3 %v4316_v16  ;;  %v4707_v41 = vld [vmem:[#allocation2 + $0xc80] sm:$0xf0]  ;;  %v4367_v16 = vld [vmem:[#allocation2 + $0xd20] sm:$0xf] }
 0x2a9   :  { %v4368_v18 = vor.u32 %v4714_v15, %v4367_v16 }
 0x2aa   :  { %v2127_v52 = vadd.f32 %v2126_v40, %v2113_v19  ;;  %v4339_v40 = vld [vmem:[#allocation2 + $0xc78] sm:$0xf]  ;;  %v4335_v19 = vld [vmem:[#allocation2 + $0xc60] sm:$0xf] }
 0x2ab   :  { %2757 = vmatpush.bf16.msrb.mxu2 %v4272_v42  ;;  %v4340_v42 = vor.u32 %v4707_v41, %v4339_v40 }
 0x2ac   :  { %v2141_v60 = vadd.f32 %v2140_v30, %v2127_v52  ;;  %2984 = vmatpush.bf16.msrb.mxu3 %v4312_v24  ;;  %v4300_v30 = vor.u32 %v4697_v44, %v4299_v43  ;;  %v4696_v52 = vld [vmem:[#allocation2 + $0xb78] sm:$0xf0]  ;;  %v4711_v43 = vld [vmem:[#allocation2 + $0xce0] sm:$0xf0] }
 0x2ae   :  { %v2147_v4 = vmax.f32 %v2141_v60, 0.0 }
 0x2af   :  { %v2114_v53 = vpop.f32.mrf.mxu3  ;;  %2758 = vmatpush.bf16.msrb.mxu2 %v4260_v47  ;;  %v4706_v47 = vld [vmem:[#allocation2 + $0xc68] sm:$0xf0] }
 0x2b0   :  { %v2115_v21 = vadd.f32 %v2114_v53, %v1631_v36  ;;  %v4698_v36 = vld [vmem:[#allocation2 + $0xba8] sm:$0xf0]  ;;  %v4336_v48 = vor.u32 %v4706_v47, %v4335_v19  ;;  %v4379_v53 = vld [vmem:[#allocation2 + $0xd68] sm:$0xf] }
 0x2b2   :  { %v2129_v49 = vadd.f32 %v2128_v59, %v2115_v21  ;;  %v4717_v21 = vld [vmem:[#allocation2 + $0xd70] sm:$0xf0] }
 0x2b3   :  { %2759 = vmatpush.bf16.msrb.mxu2 %v4248_v54  ;;  %v4296_v54 = vor.u32 %v4696_v52, %v4295_v50  ;;  %v4380_v55 = vor.u32 %v4717_v21, %v4379_v53  ;;  %v4705_v59 = vld [vmem:[#allocation2 + $0xc50] sm:$0xf0]  ;;  %v4710_v50 = vld [vmem:[#allocation2 + $0xcc8] sm:$0xf0] }
 0x2b4   :  { %v2143_v0 = vadd.f32 %v2142_v62, %v2129_v49  ;;  %v4332_v60 = vor.u32 %v4705_v59, %v4331_v56  ;;  %v4291_v49 = vld [vmem:[#allocation2 + $0xb58] sm:$0xf]  ;;  %v4695_v62 = vld [vmem:[#allocation2 + $0xb60] sm:$0xf0] }
 0x2b5   :  { %3011 = vmatpush.bf16.msra.mxu1 %v4380_v55 }
 0x2b6   :  { %v2150_v6 = vmax.f32 %v2143_v0, 0.0  ;;  %2708 = vmatmul.bf16.vlgmr.msra.gmra.mxu2 %v2152_v20  ;;  %v4292_v0 = vor.u32 %v4695_v62, %v4291_v49 }
 0x2b7   :  { %2750 = vmatmul.bf16.vlgmr.msrb.gmra.mxu1 %v2152_v20  ;;  %2760 = vmatpush.bf16.msrb.mxu2 %v4236_v63  ;;  %v4699_v20 = vld [vmem:[#allocation2 + $0xbc0] sm:$0xf0]  ;;  %v4375_v63 = vld [vmem:[#allocation2 + $0xd50] sm:$0xf] }
 0x2b8   :  { %v2153_v45 = vpack.c.bf16 %v2150_v6, %v2147_v4  ;;  %v4308_v33 = vor.u32 %v4699_v20, %v4307_v29  ;;  %v4376_v3 = vor.u32 %v4716_v1, %v4375_v63  ;;  %v4327_v4 = vld [vmem:[#allocation2 + $0xc30] sm:$0xf]  ;;  %v4704_v6 = vld [vmem:[#allocation2 + $0xc38] sm:$0xf0]  ;;  %v4363_v20 = vld [vmem:[#allocation2 + $0xd08] sm:$0xf] }
 0x2ba   :  { %2680 = vmatmul.bf16.vlgmr.msra.gmra.mxu0 %v2153_v45  ;;  %2722 = vmatmul.bf16.vlgmr.msra.gmra.mxu3 %v2153_v45 }
 0x2bb   :  { %2761 = vmatpush.bf16.msrb.mxu2 %v4224_v7  ;;  %2997 = vmatpush.bf16.msra.mxu0 %v4348_v22  ;;  %v4328_v7 = vor.u32 %v4704_v6, %v4327_v4  ;;  %v4320_v22 = vor.u32 %v4702_v26, %v4319_v46 }
 0x2bc   :  { %2985 = vmatpush.bf16.msrb.mxu3 %v4308_v33  ;;  %3012 = vmatpush.bf16.msra.mxu1 %v4376_v3  ;;  %v4713_v33 = vld [vmem:[#allocation2 + $0xd10] sm:$0xf0] }
 0x2bd   :  { %v4364_v34 = vor.u32 %v4713_v33, %v4363_v20 }
 0x2bf   :  { %2762 = vmatpush.bf16.msrb.mxu2 %v4212_v11  ;;  %2998 = vmatpush.bf16.msra.mxu0 %v4344_v35  ;;  %v4712_v35 = vld [vmem:[#allocation2 + $0xcf8] sm:$0xf0] }
 0x2c0   :  { %3013 = vmatpush.bf16.msra.mxu1 %v4372_v38 }
 0x2c3   :  { %2763 = vmatpush.bf16.msrb.mxu2 %v4200_v39  ;;  %2999 = vmatpush.bf16.msra.mxu0 %v4340_v42  ;;  %v4323_v39 = vld [vmem:[#allocation2 + $0xc18] sm:$0xf] }
 0x2c4   :  { %v4324_v57 = vor.u32 %v4703_v61, %v4323_v39  ;;  %3014 = vmatpush.bf16.msra.mxu1 %v4368_v18  ;;  %v4355_v42 = vld [vmem:[#allocation2 + $0xcd8] sm:$0xf] }
 0x2c5   :  { %v4356_v44 = vor.u32 %v4711_v43, %v4355_v42 }
 0x2c6   :  { %2764 = vmatmul.bf16.vlgmr.msrb.gmra.mxu2 %v2153_v45  ;;  %v4287_v45 = vld [vmem:[#allocation2 + $0xb40] sm:$0xf] }
 0x2c7   :  { %3000 = vmatpush.bf16.msra.mxu0 %v4336_v48  ;;  %v4288_v11 = vor.u32 %v4694_v31, %v4287_v45  ;;  %v4351_v48 = vld [vmem:[#allocation2 + $0xcc0] sm:$0xf] }
 0x2c8   :  { %3015 = vmatpush.bf16.msra.mxu1 %v4364_v34  ;;  %v4352_v52 = vor.u32 %v4710_v50, %v4351_v48 }
 0x2ca   :  { %2736 = vmatmul.bf16.vlgmr.msrb.gmra.mxu0 %v2151_v58  ;;  %v4303_v58 = vld [vmem:[#allocation2 + $0xba0] sm:$0xf] }
 0x2cb   :  { %v4304_v37 = vor.u32 %v4698_v36, %v4303_v58  ;;  %3001 = vmatpush.bf16.msra.mxu0 %v4332_v60  ;;  %v4360_v58 = vor.u32 %v4712_v35, %v4359_v5  ;;  %v2252_v36 = vld [vmem:[#allocation4 + $0xc] sm:$0x7] }
 0x2cc   :  { %v2254_v40 = vperm.slane %v2252_v36, 0  ;;  %v2256_v27 = vperm.slane %v2252_v36, 2 }
 0x2cd   :  { %2986 = vmatpush.bf16.msrb.mxu3 %v4304_v37  ;;  %3016 = vmatpush.bf16.msra.mxu1 %v4360_v58 }
 0x2cf   :  { %3002 = vmatpush.bf16.msra.mxu0 %v4328_v7 }
 0x2d1   :  { %2987 = vmatpush.bf16.msrb.mxu3 %v4300_v30  ;;  %3017 = vmatpush.bf16.msra.mxu1 %v4356_v44 }
 0x2d3   :  { %3003 = vmatpush.bf16.msra.mxu0 %v4324_v57 }
 0x2d5   :  { %2988 = vmatpush.bf16.msrb.mxu3 %v4296_v54  ;;  %v2255_v54 = vperm.slane %v2252_v36, 1  ;;  %3018 = vmatpush.bf16.msra.mxu1 %v4352_v52  ;;  %v4724_v36 = vld [vmem:[#allocation4 + $0xf] ss:$0 sm:$0xff] }
 0x2d7   :  { %3004 = vmatpush.bf16.msra.mxu0 %v4320_v22 }
 0x2d9   :  { %2989 = vmatpush.bf16.msrb.mxu3 %v4292_v0 }
 0x2dd   :  { %2990 = vmatpush.bf16.msrb.mxu3 %v4288_v11 }
 0x324   :  { %v2695_v41 = vpop.f32.mrf.mxu1 }
 0x325   :  { %v2696_v49 = vadd.f32 %v2695_v41, %v2255_v54 }
 0x329   :  { %v2653_v24 = vpop.f32.mrf.mxu2  ;;  %v2667_v29 = vpop.f32.mrf.mxu3 }
 0x32a   :  { %v2654_v19 = vadd.f32 %v2653_v24, %v2254_v40 }
 0x32c   :  { %v2668_v21 = vadd.f32 %v2667_v29, %v2654_v19  ;;  %v2697_v59 = vpop.f32.mrf.mxu1 }
 0x32d   :  { %v2698_v6 = vadd.f32 %v2697_v59, %v2255_v54 }
 0x331   :  { %v2655_v37 = vpop.f32.mrf.mxu2  ;;  %v2669_v30 = vpop.f32.mrf.mxu3 }
 0x332   :  { %v2656_v55 = vadd.f32 %v2655_v37, %v2254_v40 }
 0x334   :  { %v2670_v62 = vadd.f32 %v2669_v30, %v2656_v55  ;;  %v2751_v14 = vpop.f32.mrf.mxu1 }
 0x337   :  { %v2681_v47 = vpop.f32.mrf.mxu0 }
 0x338   :  { %v2682_v56 = vadd.f32 %v2681_v47, %v2668_v21 }
 0x339   :  { %v2709_v53 = vpop.f32.mrf.mxu2 }
 0x33a   :  { %v2770_v0 = vadd.f32 %v2682_v56, %v1520_v25  ;;  %v2710_v1 = vadd.f32 %v2709_v53, %v2696_v49 }
 0x33c   :  { %v2776_v31 = vmax.f32 %v2770_v0, 0.0  ;;  %v2753_v2 = vpop.f32.mrf.mxu1 }
 0x33d   :  { %v2723_v60 = vpop.f32.mrf.mxu3 }
 0x33e   :  { %v2724_v7 = vadd.f32 %v2723_v60, %v2710_v1 }
 0x33f   :  { %v2683_v63 = vpop.f32.mrf.mxu0 }
 0x340   :  { %v2684_v3 = vadd.f32 %v2683_v63, %v2670_v62  ;;  %v2771_v39 = vadd.f32 %v2724_v7, %v1521_v10 }
 0x341   :  { %v2711_v4 = vpop.f32.mrf.mxu2 }
 0x342   :  { %v2773_v45 = vadd.f32 %v2684_v3, %v1523_v17  ;;  %v2712_v11 = vadd.f32 %v2711_v4, %v2698_v6  ;;  %v2777_v28 = vmax.f32 %v2771_v39, 0.0 }
 0x344   :  { %v2779_v9 = vmax.f32 %v2773_v45, 0.0 }
 0x345   :  { %v2725_v38 = vpop.f32.mrf.mxu3 }
 0x346   :  { %v2782_v61 = vpack.c.bf16 %v2779_v9, %v2776_v31  ;;  %v2726_v57 = vadd.f32 %v2725_v38, %v2712_v11 }
 0x347   :  { %v2737_v25 = vpop.f32.mrf.mxu0 }
 0x348   :  { %v2774_v16 = vadd.f32 %v2726_v57, %v1524_v23  ;;  %v2738_v15 = vadd.f32 %v2737_v25, %v2256_v27  ;;  %2991 = vmatmul.bf16.vlgmr.msrb.gmra.mxu3 %v2782_v61 }
 0x349   :  { %v2765_v18 = vpop.f32.mrf.mxu2 }
 0x34a   :  { %v2780_v17 = vmax.f32 %v2774_v16, 0.0  ;;  %v2752_v46 = vadd.f32 %v2751_v14, %v2738_v15 }
 0x34c   :  { %v2783_v24 = vpack.c.bf16 %v2780_v17, %v2777_v28  ;;  %v2766_v22 = vadd.f32 %v2765_v18, %v2752_v46 }
 0x34e   :  { %3005 = vmatmul.bf16.vlgmr.msra.gmra.mxu0 %v2783_v24  ;;  %v2772_v33 = vadd.f32 %v2766_v22, %v1522_v12 }
 0x34f   :  { %v2739_v26 = vpop.f32.mrf.mxu0 }
 0x350   :  { %v2740_v29 = vadd.f32 %v2739_v26, %v2256_v27  ;;  %v2778_v23 = vmax.f32 %v2772_v33, 0.0 }
 0x351   :  { %v2767_v20 = vpop.f32.mrf.mxu2 }
 0x352   :  { %v2754_v10 = vadd.f32 %v2753_v2, %v2740_v29 }
 0x354   :  { %v2768_v34 = vadd.f32 %v2767_v20, %v2754_v10 }
 0x356   :  { %v2775_v32 = vadd.f32 %v2768_v34, %v1525_v13 }
 0x358   :  { %v2781_v5 = vmax.f32 %v2775_v32, 0.0 }
 0x35a   :  { %v2784_v35 = vpack.c.bf16 %v2781_v5, %v2778_v23 }
 0x35c   :  { %3019 = vmatmul.bf16.vlgmr.msra.gmra.mxu1 %v2784_v35 }
 0x3cb   :  { %v2992_v58 = vpop.f32.mrf.mxu3  ;;  %v3006_v40 = vpop.f32.mrf.mxu0 }
 0x3cc   :  { %v2993_v37 = vadd.f32 %v4724_v36, %v2992_v58 }
 0x3ce   :  { %v3007_v41 = vadd.f32 %v3006_v40, %v2993_v37 }
 0x3d3   :  { %v2994_v42 = vpop.f32.mrf.mxu3  ;;  %v3008_v51 = vpop.f32.mrf.mxu0 }
 0x3d4   :  { %v2995_v30 = vadd.f32 %v4724_v36, %v2994_v42 }
 0x3d6   :  { %v3009_v8 = vadd.f32 %v3008_v51, %v2995_v30 }
 0x3d9   :  { %v3020_v43 = vpop.f32.mrf.mxu1 }
 0x3da   :  { %v3021_v44 = vadd.f32 %v3020_v43, %v3007_v41 }
 0x3dc   :  { %3025 = vst [vmem:[%s4966_s3] sm:$0xff] %v3021_v44 }
 0x3e1   :  { %v3022_v12 = vpop.f32.mrf.mxu1 }
 0x3e2   :  { %v3023_v13 = vadd.f32 %v3022_v12, %v3009_v8 }
 0x3e4   :  { %3026 = vst [vmem:[%s4966_s3 + $0x8] sm:$0xff] %v3023_v13 }
 0x3e5   :  { %3031 = vsyncpa [#allocation3], 1 }
 0x3e6   :  { %3032 = vsyncpa [#allocation5], 1 }

</bundles_post_ra>
